<compile_context>
chip_gen: v7x
topology: tpu7x:2x2x1
jax: 0.10.0
libtpu: 0.0.40
codegen_flags: <defaults>
</compile_context>

<pallas_src>
import functools

import jax
import jax.numpy as jnp
from jax.experimental import pallas as pl
from jax.experimental.pallas import tpu as pltpu

_EPS = 1e-5


# ------------------------------ fused kernel ---------------------------------
def _fused_pairwise_kernel(*refs, cfg, H0, W0):
    """Whole PairWiseRelation forward for one batch element.

    refs layout: [w_0, b_0, ..., w_{L-1}, b_{L-1}, x_ref, o_ref, scr_ref]
      w_i : SMEM (cout_i * cin_i,) f32   (flattened (cout, cin) 1x1-conv weight)
      b_i : SMEM (cout_i,) f32
      x   : VMEM (1, C0, H0, W0) f32     (NCHW block, one batch element)
      o   : VMEM (1, Hf, Wf) f32
      scr : VMEM (C_scr, H0, W0) f32     (max-pool assembly scratch)
    cfg : tuple of (cin, cout, pool_k) per layer (static).
    """
    n_layers = len(cfg)
    x_ref = refs[2 * n_layers]
    o_ref = refs[2 * n_layers + 1]
    scr = refs[2 * n_layers + 2]

    xb = x_ref[0]                                     # (C0, H0, W0)
    chans = [xb[ci] for ci in range(cfg[0][0])]       # channel-planar list of (H, W)
    H, W = H0, W0

    for li, (cin, cout, k) in enumerate(cfg):
        w_ref = refs[2 * li]
        b_ref = refs[2 * li + 1]

        # ---- 1x1 conv as an unrolled VPU FMA over input channels (no MXU) ----
        conv = []
        for co in range(cout):
            acc = chans[0] * w_ref[co * cin] + b_ref[co]      # bias folded into 1st FMA
            for ci in range(1, cin):
                acc = acc + chans[ci] * w_ref[co * cin + ci]
            conv.append(acc)
        chans = conv

        # ---- MaxPool2d(kernel_size=k, stride=k), floor mode ----
        if k > 1:
            Hp, Wp = H // k, W // k
            pooled = []
            for co, a in enumerate(chans):
                if Hp * k != H or Wp * k != W:                # floor-mode truncation
                    a = a[: Hp * k, : Wp * k]
                # pool along H: per output row, max of k row slices, assemble in scratch
                for hp in range(Hp):
                    r = a[hp * k: hp * k + 1, :]
                    for kk in range(1, k):
                        r = jnp.maximum(r, a[hp * k + kk: hp * k + kk + 1, :])
                    scr[co, hp: hp + 1, : Wp * k] = r
                ah = scr[co, :Hp, : Wp * k]                   # (Hp, Wp*k) value
                # pool along W: per output column, max of k column slices
                for wp in range(Wp):
                    c = ah[:, wp * k: wp * k + 1]
                    for kk in range(1, k):
                        c = jnp.maximum(c, ah[:, wp * k + kk: wp * k + kk + 1])
                    scr[co, :Hp, wp: wp + 1] = c
                pooled.append(scr[co, :Hp, :Wp])              # (Hp, Wp) value
            chans = pooled
            H, W = Hp, Wp

        # ---- ReLU + InstanceNorm2d (affine=False, biased variance, eps=1e-5) ----
        normed = []
        for a in chans:
            a = jnp.maximum(a, 0.0)
            mean = jnp.mean(a, axis=(0, 1), keepdims=True)
            cen = a - mean
            var = jnp.mean(cen * cen, axis=(0, 1), keepdims=True)
            normed.append(cen * jax.lax.rsqrt(var + _EPS))
        chans = normed

    # TODO(synk): nn.Dropout is identity at inference; training-mode dropout RNG not modeled.

    # ---- v + v^T followed by a global softmax over all Hf*Wf entries ----
    v = chans[0]                                      # final channel count is 1; (Hf, Wf), Hf == Wf
    z = v + v.T
    m = jnp.max(z, axis=(0, 1), keepdims=True)
    e = jnp.exp(z - m)
    s = jnp.sum(e, axis=(0, 1), keepdims=True)
    o_ref[0] = e * pl.reciprocal(s, approx=False)     # EUP reciprocal instead of VALU divide


# ------------------------------- module glue ---------------------------------
def pairwise_relation_forward(x_nchw, params):
    """x_nchw: (B, SUBSPACE_DIM, H, W) -> (B, 1, Hf, Wf) with Hf == Wf (inference)."""
    x = x_nchw.astype(jnp.float32)
    B, C0, H0, W0 = x.shape

    cfg = []
    H, W = H0, W0
    c_scr = 1
    for p in params:
        cout, cin = p["w"].shape
        k = int(p["pool_k"])
        cfg.append((cin, cout, k))
        if k > 1:
            H, W = H // k, W // k
            c_scr = max(c_scr, cout)
    cfg = tuple(cfg)
    assert cfg[0][0] == C0 and cfg[-1][1] == 1 and H == W

    smem = pltpu.MemorySpace.SMEM
    args, specs = [], []
    for p in params:
        args.append(p["w"].astype(jnp.float32).reshape(-1))    # (cout*cin,)
        specs.append(pl.BlockSpec(memory_space=smem))
        args.append(p["b"].astype(jnp.float32).reshape(-1))    # (cout,)
        specs.append(pl.BlockSpec(memory_space=smem))
    args.append(x)
    specs.append(pl.BlockSpec((1, C0, H0, W0), lambda b: (b, 0, 0, 0)))

    out = pl.pallas_call(
        functools.partial(_fused_pairwise_kernel, cfg=cfg, H0=H0, W0=W0),
        out_shape=jax.ShapeDtypeStruct((B, H, W), jnp.float32),
        grid=(B,),
        in_specs=specs,
        out_specs=pl.BlockSpec((1, H, W), lambda b: (b, 0, 0)),
        scratch_shapes=[pltpu.VMEM((c_scr, H0, W0), jnp.float32)],
        compiler_params=pltpu.CompilerParams(dimension_semantics=("parallel",)),
    )(*args)
    return out[:, None, :, :]                                   # (B, 1, Hf, Wf)


def init_pairwise_relation_params(key, subspace_dim, conv_layers_num):
    """Deterministic Xavier-uniform 1x1-conv weights ((Cout, Cin) layout); zero biases."""
    sizes = []
    cin = subspace_dim
    for _ in range(conv_layers_num - 1):
        cout = cin // 2
        sizes.append((cin, cout))
        cin = cout
    sizes.append((cin, 1))
    params = []
    for (cin, cout) in sizes:
        key, wk = jax.random.split(key)
        bound = (6.0 / (cin + cout)) ** 0.5
        w = jax.random.uniform(wk, (cout, cin), jnp.float32, -bound, bound)
        b = jnp.zeros((cout,), jnp.float32)
        # MaxPool2d(kernel_size=output_size) in the reference module
        params.append({"w": w, "b": b, "pool_k": cout})
    return params


def _reference_forward(x_nchw, params):
    """Pure-JAX (XLA) reference of the same forward pass, for numerical checking."""
    x = x_nchw.astype(jnp.float32)
    for p in params:
        w, b, k = p["w"], p["b"], int(p["pool_k"])
        x = jnp.einsum("oc,bchw->bohw", w, x) + b[None, :, None, None]
        if k > 1:
            B, C, H, W = x.shape
            Hp, Wp = H // k, W // k
            x = x[:, :, : Hp * k, : Wp * k].reshape(B, C, Hp, k, Wp, k).max(axis=(3, 5))
        x = jnp.maximum(x, 0.0)
        mean = x.mean(axis=(2, 3), keepdims=True)
        var = ((x - mean) ** 2).mean(axis=(2, 3), keepdims=True)
        x = (x - mean) * jax.lax.rsqrt(var + _EPS)
    z = x + jnp.swapaxes(x, 2, 3)
    B = z.shape[0]
    sm = jax.nn.softmax(z.reshape(B, -1), axis=-1)
    return sm.reshape(z.shape)


if __name__ == "__main__":
    class Cfg:
        SUBSPACE_DIM = 4
        CONV_LAYERS_NUM = 2
        DROPOUT_R = 0.1

    key = jax.random.PRNGKey(0)
    pkey, xkey = jax.random.split(key)
    params = init_pairwise_relation_params(pkey, Cfg.SUBSPACE_DIM, Cfg.CONV_LAYERS_NUM)
    x = jax.random.normal(xkey, (2, Cfg.SUBSPACE_DIM, 16, 16), jnp.float32)

    out = jax.block_until_ready(pairwise_relation_forward(x, params))

    assert out.shape == (2, 1, 8, 8), out.shape
    sums = jnp.sum(out.reshape(2, -1), axis=-1)
    assert bool(jnp.all(jnp.abs(sums - 1.0) < 1e-4)), sums

    ref = jax.block_until_ready(_reference_forward(x, params))
    max_err = float(jnp.max(jnp.abs(out - ref)))
    assert max_err < 1e-4, max_err

    print("KERNEL_OK")
</pallas_src>

<mosaic_0001>
module attributes {stable_mosaic.version = 11 : i64} {
  func.func @_fused_pairwise_kernel(%arg0: i32, %arg1: memref<8xf32, #tpu.memory_space<smem>>, %arg2: memref<2xf32, #tpu.memory_space<smem>>, %arg3: memref<2xf32, #tpu.memory_space<smem>>, %arg4: memref<1xf32, #tpu.memory_space<smem>>, %arg5: memref<1x4x16x16xf32, #tpu.memory_space<vmem>>, %arg6: memref<1x8x8xf32, #tpu.memory_space<vmem>>, %arg7: memref<2x16x16xf32, #tpu.memory_space<vmem>>) attributes {dimension_semantics = [#tpu.dimension_semantics<parallel>], iteration_bounds = array<i64: 2>, scalar_prefetch = 0 : i64, scratch_operands = 1 : i64, tpu.core_type = #tpu.core_type<tc>, window_params = [{transform_indices = @transform_0, window_bounds = array<i64: 8>}, {transform_indices = @transform_1, window_bounds = array<i64: 2>}, {transform_indices = @transform_2, window_bounds = array<i64: 2>}, {transform_indices = @transform_3, window_bounds = array<i64: 1>}, {transform_indices = @transform_4, window_bounds = array<i64: 1, 4, 16, 16>}, {transform_indices = @transform_5, window_bounds = array<i64: 1, 8, 8>}]} {
    %c0 = arith.constant 0 : index
    %c0_0 = arith.constant 0 : index
    %c0_1 = arith.constant 0 : index
    %c0_2 = arith.constant 0 : index
    %0 = vector.load %arg5[%c0, %c0_0, %c0_1, %c0_2] : memref<1x4x16x16xf32, #tpu.memory_space<vmem>>, vector<1x4x16x16xf32>
    %1 = vector.shape_cast %0 : vector<1x4x16x16xf32> to vector<4x16x16xf32>
    %2 = vector.extract_strided_slice %1 {offsets = [0, 0, 0], sizes = [1, 16, 16], strides = [1, 1, 1]} : vector<4x16x16xf32> to vector<1x16x16xf32>
    %3 = vector.shape_cast %2 : vector<1x16x16xf32> to vector<16x16xf32>
    %4 = vector.extract_strided_slice %1 {offsets = [1, 0, 0], sizes = [1, 16, 16], strides = [1, 1, 1]} : vector<4x16x16xf32> to vector<1x16x16xf32>
    %5 = vector.shape_cast %4 : vector<1x16x16xf32> to vector<16x16xf32>
    %6 = vector.extract_strided_slice %1 {offsets = [2, 0, 0], sizes = [1, 16, 16], strides = [1, 1, 1]} : vector<4x16x16xf32> to vector<1x16x16xf32>
    %7 = vector.shape_cast %6 : vector<1x16x16xf32> to vector<16x16xf32>
    %8 = vector.extract_strided_slice %1 {offsets = [3, 0, 0], sizes = [1, 16, 16], strides = [1, 1, 1]} : vector<4x16x16xf32> to vector<1x16x16xf32>
    %9 = vector.shape_cast %8 : vector<1x16x16xf32> to vector<16x16xf32>
    %c0_3 = arith.constant 0 : index
    %10 = memref.load %arg1[%c0_3] : memref<8xf32, #tpu.memory_space<smem>>
    %11 = vector.broadcast %10 : f32 to vector<16x16xf32>
    %12 = arith.mulf %3, %11 : vector<16x16xf32>
    %c0_4 = arith.constant 0 : index
    %13 = memref.load %arg2[%c0_4] : memref<2xf32, #tpu.memory_space<smem>>
    %14 = vector.broadcast %13 : f32 to vector<16x16xf32>
    %15 = arith.addf %12, %14 : vector<16x16xf32>
    %c1 = arith.constant 1 : index
    %16 = memref.load %arg1[%c1] : memref<8xf32, #tpu.memory_space<smem>>
    %17 = vector.broadcast %16 : f32 to vector<16x16xf32>
    %18 = arith.mulf %5, %17 : vector<16x16xf32>
    %19 = arith.addf %15, %18 : vector<16x16xf32>
    %c2 = arith.constant 2 : index
    %20 = memref.load %arg1[%c2] : memref<8xf32, #tpu.memory_space<smem>>
    %21 = vector.broadcast %20 : f32 to vector<16x16xf32>
    %22 = arith.mulf %7, %21 : vector<16x16xf32>
    %23 = arith.addf %19, %22 : vector<16x16xf32>
    %c3 = arith.constant 3 : index
    %24 = memref.load %arg1[%c3] : memref<8xf32, #tpu.memory_space<smem>>
    %25 = vector.broadcast %24 : f32 to vector<16x16xf32>
    %26 = arith.mulf %9, %25 : vector<16x16xf32>
    %27 = arith.addf %23, %26 : vector<16x16xf32>
    %c4 = arith.constant 4 : index
    %28 = memref.load %arg1[%c4] : memref<8xf32, #tpu.memory_space<smem>>
    %29 = vector.broadcast %28 : f32 to vector<16x16xf32>
    %30 = arith.mulf %3, %29 : vector<16x16xf32>
    %c1_5 = arith.constant 1 : index
    %31 = memref.load %arg2[%c1_5] : memref<2xf32, #tpu.memory_space<smem>>
    %32 = vector.broadcast %31 : f32 to vector<16x16xf32>
    %33 = arith.addf %30, %32 : vector<16x16xf32>
    %c5 = arith.constant 5 : index
    %34 = memref.load %arg1[%c5] : memref<8xf32, #tpu.memory_space<smem>>
    %35 = vector.broadcast %34 : f32 to vector<16x16xf32>
    %36 = arith.mulf %5, %35 : vector<16x16xf32>
    %37 = arith.addf %33, %36 : vector<16x16xf32>
    %c6 = arith.constant 6 : index
    %38 = memref.load %arg1[%c6] : memref<8xf32, #tpu.memory_space<smem>>
    %39 = vector.broadcast %38 : f32 to vector<16x16xf32>
    %40 = arith.mulf %7, %39 : vector<16x16xf32>
    %41 = arith.addf %37, %40 : vector<16x16xf32>
    %c7 = arith.constant 7 : index
    %42 = memref.load %arg1[%c7] : memref<8xf32, #tpu.memory_space<smem>>
    %43 = vector.broadcast %42 : f32 to vector<16x16xf32>
    %44 = arith.mulf %9, %43 : vector<16x16xf32>
    %45 = arith.addf %41, %44 : vector<16x16xf32>
    %46 = vector.extract_strided_slice %27 {offsets = [0, 0], sizes = [1, 16], strides = [1, 1]} : vector<16x16xf32> to vector<1x16xf32>
    %47 = vector.extract_strided_slice %27 {offsets = [1, 0], sizes = [1, 16], strides = [1, 1]} : vector<16x16xf32> to vector<1x16xf32>
    %48 = arith.maximumf %46, %47 : vector<1x16xf32>
    %c0_6 = arith.constant 0 : index
    %c0_7 = arith.constant 0 : index
    %c0_8 = arith.constant 0 : index
    %49 = vector.load %arg7[%c0_6, %c0_7, %c0_8] : memref<2x16x16xf32, #tpu.memory_space<vmem>>, vector<1x1x16xf32>
    %50 = vector.shape_cast %49 : vector<1x1x16xf32> to vector<1x16xf32>
    %51 = vector.shape_cast %48 : vector<1x16xf32> to vector<1x1x16xf32>
    tpu.vector_store %arg7[%c0_6, %c0_7, %c0_8], %51 {strides = array<i32>} : memref<2x16x16xf32, #tpu.memory_space<vmem>>, vector<1x1x16xf32>,
    %52 = vector.extract_strided_slice %27 {offsets = [2, 0], sizes = [1, 16], strides = [1, 1]} : vector<16x16xf32> to vector<1x16xf32>
    %53 = vector.extract_strided_slice %27 {offsets = [3, 0], sizes = [1, 16], strides = [1, 1]} : vector<16x16xf32> to vector<1x16xf32>
    %54 = arith.maximumf %52, %53 : vector<1x16xf32>
    %c0_9 = arith.constant 0 : index
    %c1_10 = arith.constant 1 : index
    %c0_11 = arith.constant 0 : index
    %55 = vector.load %arg7[%c0_9, %c1_10, %c0_11] : memref<2x16x16xf32, #tpu.memory_space<vmem>>, vector<1x1x16xf32>
    %56 = vector.shape_cast %55 : vector<1x1x16xf32> to vector<1x16xf32>
    %57 = vector.shape_cast %54 : vector<1x16xf32> to vector<1x1x16xf32>
    tpu.vector_store %arg7[%c0_9, %c1_10, %c0_11], %57 {strides = array<i32>} : memref<2x16x16xf32, #tpu.memory_space<vmem>>, vector<1x1x16xf32>,
    %58 = vector.extract_strided_slice %27 {offsets = [4, 0], sizes = [1, 16], strides = [1, 1]} : vector<16x16xf32> to vector<1x16xf32>
    %59 = vector.extract_strided_slice %27 {offsets = [5, 0], sizes = [1, 16], strides = [1, 1]} : vector<16x16xf32> to vector<1x16xf32>
    %60 = arith.maximumf %58, %59 : vector<1x16xf32>
    %c0_12 = arith.constant 0 : index
    %c2_13 = arith.constant 2 : index
    %c0_14 = arith.constant 0 : index
    %61 = vector.load %arg7[%c0_12, %c2_13, %c0_14] : memref<2x16x16xf32, #tpu.memory_space<vmem>>, vector<1x1x16xf32>
    %62 = vector.shape_cast %61 : vector<1x1x16xf32> to vector<1x16xf32>
    %63 = vector.shape_cast %60 : vector<1x16xf32> to vector<1x1x16xf32>
    tpu.vector_store %arg7[%c0_12, %c2_13, %c0_14], %63 {strides = array<i32>} : memref<2x16x16xf32, #tpu.memory_space<vmem>>, vector<1x1x16xf32>,
    %64 = vector.extract_strided_slice %27 {offsets = [6, 0], sizes = [1, 16], strides = [1, 1]} : vector<16x16xf32> to vector<1x16xf32>
    %65 = vector.extract_strided_slice %27 {offsets = [7, 0], sizes = [1, 16], strides = [1, 1]} : vector<16x16xf32> to vector<1x16xf32>
    %66 = arith.maximumf %64, %65 : vector<1x16xf32>
    %c0_15 = arith.constant 0 : index
    %c3_16 = arith.constant 3 : index
    %c0_17 = arith.constant 0 : index
    %67 = vector.load %arg7[%c0_15, %c3_16, %c0_17] : memref<2x16x16xf32, #tpu.memory_space<vmem>>, vector<1x1x16xf32>
    %68 = vector.shape_cast %67 : vector<1x1x16xf32> to vector<1x16xf32>
    %69 = vector.shape_cast %66 : vector<1x16xf32> to vector<1x1x16xf32>
    tpu.vector_store %arg7[%c0_15, %c3_16, %c0_17], %69 {strides = array<i32>} : memref<2x16x16xf32, #tpu.memory_space<vmem>>, vector<1x1x16xf32>,
    %70 = vector.extract_strided_slice %27 {offsets = [8, 0], sizes = [1, 16], strides = [1, 1]} : vector<16x16xf32> to vector<1x16xf32>
    %71 = vector.extract_strided_slice %27 {offsets = [9, 0], sizes = [1, 16], strides = [1, 1]} : vector<16x16xf32> to vector<1x16xf32>
    %72 = arith.maximumf %70, %71 : vector<1x16xf32>
    %c0_18 = arith.constant 0 : index
    %c4_19 = arith.constant 4 : index
    %c0_20 = arith.constant 0 : index
    %73 = vector.load %arg7[%c0_18, %c4_19, %c0_20] : memref<2x16x16xf32, #tpu.memory_space<vmem>>, vector<1x1x16xf32>
    %74 = vector.shape_cast %73 : vector<1x1x16xf32> to vector<1x16xf32>
    %75 = vector.shape_cast %72 : vector<1x16xf32> to vector<1x1x16xf32>
    tpu.vector_store %arg7[%c0_18, %c4_19, %c0_20], %75 {strides = array<i32>} : memref<2x16x16xf32, #tpu.memory_space<vmem>>, vector<1x1x16xf32>,
    %76 = vector.extract_strided_slice %27 {offsets = [10, 0], sizes = [1, 16], strides = [1, 1]} : vector<16x16xf32> to vector<1x16xf32>
    %77 = vector.extract_strided_slice %27 {offsets = [11, 0], sizes = [1, 16], strides = [1, 1]} : vector<16x16xf32> to vector<1x16xf32>
    %78 = arith.maximumf %76, %77 : vector<1x16xf32>
    %c0_21 = arith.constant 0 : index
    %c5_22 = arith.constant 5 : index
    %c0_23 = arith.constant 0 : index
    %79 = vector.load %arg7[%c0_21, %c5_22, %c0_23] : memref<2x16x16xf32, #tpu.memory_space<vmem>>, vector<1x1x16xf32>
    %80 = vector.shape_cast %79 : vector<1x1x16xf32> to vector<1x16xf32>
    %81 = vector.shape_cast %78 : vector<1x16xf32> to vector<1x1x16xf32>
    tpu.vector_store %arg7[%c0_21, %c5_22, %c0_23], %81 {strides = array<i32>} : memref<2x16x16xf32, #tpu.memory_space<vmem>>, vector<1x1x16xf32>,
    %82 = vector.extract_strided_slice %27 {offsets = [12, 0], sizes = [1, 16], strides = [1, 1]} : vector<16x16xf32> to vector<1x16xf32>
    %83 = vector.extract_strided_slice %27 {offsets = [13, 0], sizes = [1, 16], strides = [1, 1]} : vector<16x16xf32> to vector<1x16xf32>
    %84 = arith.maximumf %82, %83 : vector<1x16xf32>
    %c0_24 = arith.constant 0 : index
    %c6_25 = arith.constant 6 : index
    %c0_26 = arith.constant 0 : index
    %85 = vector.load %arg7[%c0_24, %c6_25, %c0_26] : memref<2x16x16xf32, #tpu.memory_space<vmem>>, vector<1x1x16xf32>
    %86 = vector.shape_cast %85 : vector<1x1x16xf32> to vector<1x16xf32>
    %87 = vector.shape_cast %84 : vector<1x16xf32> to vector<1x1x16xf32>
    tpu.vector_store %arg7[%c0_24, %c6_25, %c0_26], %87 {strides = array<i32>} : memref<2x16x16xf32, #tpu.memory_space<vmem>>, vector<1x1x16xf32>,
    %88 = vector.extract_strided_slice %27 {offsets = [14, 0], sizes = [1, 16], strides = [1, 1]} : vector<16x16xf32> to vector<1x16xf32>
    %89 = vector.extract_strided_slice %27 {offsets = [15, 0], sizes = [1, 16], strides = [1, 1]} : vector<16x16xf32> to vector<1x16xf32>
    %90 = arith.maximumf %88, %89 : vector<1x16xf32>
    %c0_27 = arith.constant 0 : index
    %c7_28 = arith.constant 7 : index
    %c0_29 = arith.constant 0 : index
    %91 = vector.load %arg7[%c0_27, %c7_28, %c0_29] : memref<2x16x16xf32, #tpu.memory_space<vmem>>, vector<1x1x16xf32>
    %92 = vector.shape_cast %91 : vector<1x1x16xf32> to vector<1x16xf32>
    %93 = vector.shape_cast %90 : vector<1x16xf32> to vector<1x1x16xf32>
    tpu.vector_store %arg7[%c0_27, %c7_28, %c0_29], %93 {strides = array<i32>} : memref<2x16x16xf32, #tpu.memory_space<vmem>>, vector<1x1x16xf32>,
    %c0_30 = arith.constant 0 : index
    %c0_31 = arith.constant 0 : index
    %c0_32 = arith.constant 0 : index
    %94 = vector.load %arg7[%c0_30, %c0_31, %c0_32] : memref<2x16x16xf32, #tpu.memory_space<vmem>>, vector<1x8x16xf32>
    %95 = vector.shape_cast %94 : vector<1x8x16xf32> to vector<8x16xf32>
    %96 = vector.extract_strided_slice %95 {offsets = [0, 0], sizes = [8, 1], strides = [1, 1]} : vector<8x16xf32> to vector<8x1xf32>
    %97 = vector.extract_strided_slice %95 {offsets = [0, 1], sizes = [8, 1], strides = [1, 1]} : vector<8x16xf32> to vector<8x1xf32>
    %98 = arith.maximumf %96, %97 : vector<8x1xf32>
    %c0_33 = arith.constant 0 : index
    %c0_34 = arith.constant 0 : index
    %c0_35 = arith.constant 0 : index
    %99 = vector.load %arg7[%c0_33, %c0_34, %c0_35] : memref<2x16x16xf32, #tpu.memory_space<vmem>>, vector<1x8x1xf32>
    %100 = vector.shape_cast %99 : vector<1x8x1xf32> to vector<8x1xf32>
    %101 = vector.shape_cast %98 : vector<8x1xf32> to vector<1x8x1xf32>
    tpu.vector_store %arg7[%c0_33, %c0_34, %c0_35], %101 {strides = array<i32>} : memref<2x16x16xf32, #tpu.memory_space<vmem>>, vector<1x8x1xf32>,
    %102 = vector.extract_strided_slice %95 {offsets = [0, 2], sizes = [8, 1], strides = [1, 1]} : vector<8x16xf32> to vector<8x1xf32>
    %103 = vector.extract_strided_slice %95 {offsets = [0, 3], sizes = [8, 1], strides = [1, 1]} : vector<8x16xf32> to vector<8x1xf32>
    %104 = arith.maximumf %102, %103 : vector<8x1xf32>
    %c0_36 = arith.constant 0 : index
    %c0_37 = arith.constant 0 : index
    %c1_38 = arith.constant 1 : index
    %105 = vector.load %arg7[%c0_36, %c0_37, %c1_38] : memref<2x16x16xf32, #tpu.memory_space<vmem>>, vector<1x8x1xf32>
    %106 = vector.shape_cast %105 : vector<1x8x1xf32> to vector<8x1xf32>
    %107 = vector.shape_cast %104 : vector<8x1xf32> to vector<1x8x1xf32>
    tpu.vector_store %arg7[%c0_36, %c0_37, %c1_38], %107 {strides = array<i32>} : memref<2x16x16xf32, #tpu.memory_space<vmem>>, vector<1x8x1xf32>,
    %108 = vector.extract_strided_slice %95 {offsets = [0, 4], sizes = [8, 1], strides = [1, 1]} : vector<8x16xf32> to vector<8x1xf32>
    %109 = vector.extract_strided_slice %95 {offsets = [0, 5], sizes = [8, 1], strides = [1, 1]} : vector<8x16xf32> to vector<8x1xf32>
    %110 = arith.maximumf %108, %109 : vector<8x1xf32>
    %c0_39 = arith.constant 0 : index
    %c0_40 = arith.constant 0 : index
    %c2_41 = arith.constant 2 : index
    %111 = vector.load %arg7[%c0_39, %c0_40, %c2_41] : memref<2x16x16xf32, #tpu.memory_space<vmem>>, vector<1x8x1xf32>
    %112 = vector.shape_cast %111 : vector<1x8x1xf32> to vector<8x1xf32>
    %113 = vector.shape_cast %110 : vector<8x1xf32> to vector<1x8x1xf32>
    tpu.vector_store %arg7[%c0_39, %c0_40, %c2_41], %113 {strides = array<i32>} : memref<2x16x16xf32, #tpu.memory_space<vmem>>, vector<1x8x1xf32>,
    %114 = vector.extract_strided_slice %95 {offsets = [0, 6], sizes = [8, 1], strides = [1, 1]} : vector<8x16xf32> to vector<8x1xf32>
    %115 = vector.extract_strided_slice %95 {offsets = [0, 7], sizes = [8, 1], strides = [1, 1]} : vector<8x16xf32> to vector<8x1xf32>
    %116 = arith.maximumf %114, %115 : vector<8x1xf32>
    %c0_42 = arith.constant 0 : index
    %c0_43 = arith.constant 0 : index
    %c3_44 = arith.constant 3 : index
    %117 = vector.load %arg7[%c0_42, %c0_43, %c3_44] : memref<2x16x16xf32, #tpu.memory_space<vmem>>, vector<1x8x1xf32>
    %118 = vector.shape_cast %117 : vector<1x8x1xf32> to vector<8x1xf32>
    %119 = vector.shape_cast %116 : vector<8x1xf32> to vector<1x8x1xf32>
    tpu.vector_store %arg7[%c0_42, %c0_43, %c3_44], %119 {strides = array<i32>} : memref<2x16x16xf32, #tpu.memory_space<vmem>>, vector<1x8x1xf32>,
    %120 = vector.extract_strided_slice %95 {offsets = [0, 8], sizes = [8, 1], strides = [1, 1]} : vector<8x16xf32> to vector<8x1xf32>
    %121 = vector.extract_strided_slice %95 {offsets = [0, 9], sizes = [8, 1], strides = [1, 1]} : vector<8x16xf32> to vector<8x1xf32>
    %122 = arith.maximumf %120, %121 : vector<8x1xf32>
    %c0_45 = arith.constant 0 : index
    %c0_46 = arith.constant 0 : index
    %c4_47 = arith.constant 4 : index
    %123 = vector.load %arg7[%c0_45, %c0_46, %c4_47] : memref<2x16x16xf32, #tpu.memory_space<vmem>>, vector<1x8x1xf32>
    %124 = vector.shape_cast %123 : vector<1x8x1xf32> to vector<8x1xf32>
    %125 = vector.shape_cast %122 : vector<8x1xf32> to vector<1x8x1xf32>
    tpu.vector_store %arg7[%c0_45, %c0_46, %c4_47], %125 {strides = array<i32>} : memref<2x16x16xf32, #tpu.memory_space<vmem>>, vector<1x8x1xf32>,
    %126 = vector.extract_strided_slice %95 {offsets = [0, 10], sizes = [8, 1], strides = [1, 1]} : vector<8x16xf32> to vector<8x1xf32>
    %127 = vector.extract_strided_slice %95 {offsets = [0, 11], sizes = [8, 1], strides = [1, 1]} : vector<8x16xf32> to vector<8x1xf32>
    %128 = arith.maximumf %126, %127 : vector<8x1xf32>
    %c0_48 = arith.constant 0 : index
    %c0_49 = arith.constant 0 : index
    %c5_50 = arith.constant 5 : index
    %129 = vector.load %arg7[%c0_48, %c0_49, %c5_50] : memref<2x16x16xf32, #tpu.memory_space<vmem>>, vector<1x8x1xf32>
    %130 = vector.shape_cast %129 : vector<1x8x1xf32> to vector<8x1xf32>
    %131 = vector.shape_cast %128 : vector<8x1xf32> to vector<1x8x1xf32>
    tpu.vector_store %arg7[%c0_48, %c0_49, %c5_50], %131 {strides = array<i32>} : memref<2x16x16xf32, #tpu.memory_space<vmem>>, vector<1x8x1xf32>,
    %132 = vector.extract_strided_slice %95 {offsets = [0, 12], sizes = [8, 1], strides = [1, 1]} : vector<8x16xf32> to vector<8x1xf32>
    %133 = vector.extract_strided_slice %95 {offsets = [0, 13], sizes = [8, 1], strides = [1, 1]} : vector<8x16xf32> to vector<8x1xf32>
    %134 = arith.maximumf %132, %133 : vector<8x1xf32>
    %c0_51 = arith.constant 0 : index
    %c0_52 = arith.constant 0 : index
    %c6_53 = arith.constant 6 : index
    %135 = vector.load %arg7[%c0_51, %c0_52, %c6_53] : memref<2x16x16xf32, #tpu.memory_space<vmem>>, vector<1x8x1xf32>
    %136 = vector.shape_cast %135 : vector<1x8x1xf32> to vector<8x1xf32>
    %137 = vector.shape_cast %134 : vector<8x1xf32> to vector<1x8x1xf32>
    tpu.vector_store %arg7[%c0_51, %c0_52, %c6_53], %137 {strides = array<i32>} : memref<2x16x16xf32, #tpu.memory_space<vmem>>, vector<1x8x1xf32>,
    %138 = vector.extract_strided_slice %95 {offsets = [0, 14], sizes = [8, 1], strides = [1, 1]} : vector<8x16xf32> to vector<8x1xf32>
    %139 = vector.extract_strided_slice %95 {offsets = [0, 15], sizes = [8, 1], strides = [1, 1]} : vector<8x16xf32> to vector<8x1xf32>
    %140 = arith.maximumf %138, %139 : vector<8x1xf32>
    %c0_54 = arith.constant 0 : index
    %c0_55 = arith.constant 0 : index
    %c7_56 = arith.constant 7 : index
    %141 = vector.load %arg7[%c0_54, %c0_55, %c7_56] : memref<2x16x16xf32, #tpu.memory_space<vmem>>, vector<1x8x1xf32>
    %142 = vector.shape_cast %141 : vector<1x8x1xf32> to vector<8x1xf32>
    %143 = vector.shape_cast %140 : vector<8x1xf32> to vector<1x8x1xf32>
    tpu.vector_store %arg7[%c0_54, %c0_55, %c7_56], %143 {strides = array<i32>} : memref<2x16x16xf32, #tpu.memory_space<vmem>>, vector<1x8x1xf32>,
    %c0_57 = arith.constant 0 : index
    %c0_58 = arith.constant 0 : index
    %c0_59 = arith.constant 0 : index
    %144 = vector.load %arg7[%c0_57, %c0_58, %c0_59] : memref<2x16x16xf32, #tpu.memory_space<vmem>>, vector<1x8x8xf32>
    %145 = vector.shape_cast %144 : vector<1x8x8xf32> to vector<8x8xf32>
    %146 = vector.extract_strided_slice %45 {offsets = [0, 0], sizes = [1, 16], strides = [1, 1]} : vector<16x16xf32> to vector<1x16xf32>
    %147 = vector.extract_strided_slice %45 {offsets = [1, 0], sizes = [1, 16], strides = [1, 1]} : vector<16x16xf32> to vector<1x16xf32>
    %148 = arith.maximumf %146, %147 : vector<1x16xf32>
    %c1_60 = arith.constant 1 : index
    %c0_61 = arith.constant 0 : index
    %c0_62 = arith.constant 0 : index
    %149 = vector.load %arg7[%c1_60, %c0_61, %c0_62] : memref<2x16x16xf32, #tpu.memory_space<vmem>>, vector<1x1x16xf32>
    %150 = vector.shape_cast %149 : vector<1x1x16xf32> to vector<1x16xf32>
    %151 = vector.shape_cast %148 : vector<1x16xf32> to vector<1x1x16xf32>
    tpu.vector_store %arg7[%c1_60, %c0_61, %c0_62], %151 {strides = array<i32>} : memref<2x16x16xf32, #tpu.memory_space<vmem>>, vector<1x1x16xf32>,
    %152 = vector.extract_strided_slice %45 {offsets = [2, 0], sizes = [1, 16], strides = [1, 1]} : vector<16x16xf32> to vector<1x16xf32>
    %153 = vector.extract_strided_slice %45 {offsets = [3, 0], sizes = [1, 16], strides = [1, 1]} : vector<16x16xf32> to vector<1x16xf32>
    %154 = arith.maximumf %152, %153 : vector<1x16xf32>
    %c1_63 = arith.constant 1 : index
    %c1_64 = arith.constant 1 : index
    %c0_65 = arith.constant 0 : index
    %155 = vector.load %arg7[%c1_63, %c1_64, %c0_65] : memref<2x16x16xf32, #tpu.memory_space<vmem>>, vector<1x1x16xf32>
    %156 = vector.shape_cast %155 : vector<1x1x16xf32> to vector<1x16xf32>
    %157 = vector.shape_cast %154 : vector<1x16xf32> to vector<1x1x16xf32>
    tpu.vector_store %arg7[%c1_63, %c1_64, %c0_65], %157 {strides = array<i32>} : memref<2x16x16xf32, #tpu.memory_space<vmem>>, vector<1x1x16xf32>,
    %158 = vector.extract_strided_slice %45 {offsets = [4, 0], sizes = [1, 16], strides = [1, 1]} : vector<16x16xf32> to vector<1x16xf32>
    %159 = vector.extract_strided_slice %45 {offsets = [5, 0], sizes = [1, 16], strides = [1, 1]} : vector<16x16xf32> to vector<1x16xf32>
    %160 = arith.maximumf %158, %159 : vector<1x16xf32>
    %c1_66 = arith.constant 1 : index
    %c2_67 = arith.constant 2 : index
    %c0_68 = arith.constant 0 : index
    %161 = vector.load %arg7[%c1_66, %c2_67, %c0_68] : memref<2x16x16xf32, #tpu.memory_space<vmem>>, vector<1x1x16xf32>
    %162 = vector.shape_cast %161 : vector<1x1x16xf32> to vector<1x16xf32>
    %163 = vector.shape_cast %160 : vector<1x16xf32> to vector<1x1x16xf32>
    tpu.vector_store %arg7[%c1_66, %c2_67, %c0_68], %163 {strides = array<i32>} : memref<2x16x16xf32, #tpu.memory_space<vmem>>, vector<1x1x16xf32>,
    %164 = vector.extract_strided_slice %45 {offsets = [6, 0], sizes = [1, 16], strides = [1, 1]} : vector<16x16xf32> to vector<1x16xf32>
    %165 = vector.extract_strided_slice %45 {offsets = [7, 0], sizes = [1, 16], strides = [1, 1]} : vector<16x16xf32> to vector<1x16xf32>
    %166 = arith.maximumf %164, %165 : vector<1x16xf32>
    %c1_69 = arith.constant 1 : index
    %c3_70 = arith.constant 3 : index
    %c0_71 = arith.constant 0 : index
    %167 = vector.load %arg7[%c1_69, %c3_70, %c0_71] : memref<2x16x16xf32, #tpu.memory_space<vmem>>, vector<1x1x16xf32>
    %168 = vector.shape_cast %167 : vector<1x1x16xf32> to vector<1x16xf32>
    %169 = vector.shape_cast %166 : vector<1x16xf32> to vector<1x1x16xf32>
    tpu.vector_store %arg7[%c1_69, %c3_70, %c0_71], %169 {strides = array<i32>} : memref<2x16x16xf32, #tpu.memory_space<vmem>>, vector<1x1x16xf32>,
    %170 = vector.extract_strided_slice %45 {offsets = [8, 0], sizes = [1, 16], strides = [1, 1]} : vector<16x16xf32> to vector<1x16xf32>
    %171 = vector.extract_strided_slice %45 {offsets = [9, 0], sizes = [1, 16], strides = [1, 1]} : vector<16x16xf32> to vector<1x16xf32>
    %172 = arith.maximumf %170, %171 : vector<1x16xf32>
    %c1_72 = arith.constant 1 : index
    %c4_73 = arith.constant 4 : index
    %c0_74 = arith.constant 0 : index
    %173 = vector.load %arg7[%c1_72, %c4_73, %c0_74] : memref<2x16x16xf32, #tpu.memory_space<vmem>>, vector<1x1x16xf32>
    %174 = vector.shape_cast %173 : vector<1x1x16xf32> to vector<1x16xf32>
    %175 = vector.shape_cast %172 : vector<1x16xf32> to vector<1x1x16xf32>
    tpu.vector_store %arg7[%c1_72, %c4_73, %c0_74], %175 {strides = array<i32>} : memref<2x16x16xf32, #tpu.memory_space<vmem>>, vector<1x1x16xf32>,
    %176 = vector.extract_strided_slice %45 {offsets = [10, 0], sizes = [1, 16], strides = [1, 1]} : vector<16x16xf32> to vector<1x16xf32>
    %177 = vector.extract_strided_slice %45 {offsets = [11, 0], sizes = [1, 16], strides = [1, 1]} : vector<16x16xf32> to vector<1x16xf32>
    %178 = arith.maximumf %176, %177 : vector<1x16xf32>
    %c1_75 = arith.constant 1 : index
    %c5_76 = arith.constant 5 : index
    %c0_77 = arith.constant 0 : index
    %179 = vector.load %arg7[%c1_75, %c5_76, %c0_77] : memref<2x16x16xf32, #tpu.memory_space<vmem>>, vector<1x1x16xf32>
    %180 = vector.shape_cast %179 : vector<1x1x16xf32> to vector<1x16xf32>
    %181 = vector.shape_cast %178 : vector<1x16xf32> to vector<1x1x16xf32>
    tpu.vector_store %arg7[%c1_75, %c5_76, %c0_77], %181 {strides = array<i32>} : memref<2x16x16xf32, #tpu.memory_space<vmem>>, vector<1x1x16xf32>,
    %182 = vector.extract_strided_slice %45 {offsets = [12, 0], sizes = [1, 16], strides = [1, 1]} : vector<16x16xf32> to vector<1x16xf32>
    %183 = vector.extract_strided_slice %45 {offsets = [13, 0], sizes = [1, 16], strides = [1, 1]} : vector<16x16xf32> to vector<1x16xf32>
    %184 = arith.maximumf %182, %183 : vector<1x16xf32>
    %c1_78 = arith.constant 1 : index
    %c6_79 = arith.constant 6 : index
    %c0_80 = arith.constant 0 : index
    %185 = vector.load %arg7[%c1_78, %c6_79, %c0_80] : memref<2x16x16xf32, #tpu.memory_space<vmem>>, vector<1x1x16xf32>
    %186 = vector.shape_cast %185 : vector<1x1x16xf32> to vector<1x16xf32>
    %187 = vector.shape_cast %184 : vector<1x16xf32> to vector<1x1x16xf32>
    tpu.vector_store %arg7[%c1_78, %c6_79, %c0_80], %187 {strides = array<i32>} : memref<2x16x16xf32, #tpu.memory_space<vmem>>, vector<1x1x16xf32>,
    %188 = vector.extract_strided_slice %45 {offsets = [14, 0], sizes = [1, 16], strides = [1, 1]} : vector<16x16xf32> to vector<1x16xf32>
    %189 = vector.extract_strided_slice %45 {offsets = [15, 0], sizes = [1, 16], strides = [1, 1]} : vector<16x16xf32> to vector<1x16xf32>
    %190 = arith.maximumf %188, %189 : vector<1x16xf32>
    %c1_81 = arith.constant 1 : index
    %c7_82 = arith.constant 7 : index
    %c0_83 = arith.constant 0 : index
    %191 = vector.load %arg7[%c1_81, %c7_82, %c0_83] : memref<2x16x16xf32, #tpu.memory_space<vmem>>, vector<1x1x16xf32>
    %192 = vector.shape_cast %191 : vector<1x1x16xf32> to vector<1x16xf32>
    %193 = vector.shape_cast %190 : vector<1x16xf32> to vector<1x1x16xf32>
    tpu.vector_store %arg7[%c1_81, %c7_82, %c0_83], %193 {strides = array<i32>} : memref<2x16x16xf32, #tpu.memory_space<vmem>>, vector<1x1x16xf32>,
    %c1_84 = arith.constant 1 : index
    %c0_85 = arith.constant 0 : index
    %c0_86 = arith.constant 0 : index
    %194 = vector.load %arg7[%c1_84, %c0_85, %c0_86] : memref<2x16x16xf32, #tpu.memory_space<vmem>>, vector<1x8x16xf32>
    %195 = vector.shape_cast %194 : vector<1x8x16xf32> to vector<8x16xf32>
    %196 = vector.extract_strided_slice %195 {offsets = [0, 0], sizes = [8, 1], strides = [1, 1]} : vector<8x16xf32> to vector<8x1xf32>
    %197 = vector.extract_strided_slice %195 {offsets = [0, 1], sizes = [8, 1], strides = [1, 1]} : vector<8x16xf32> to vector<8x1xf32>
    %198 = arith.maximumf %196, %197 : vector<8x1xf32>
    %c1_87 = arith.constant 1 : index
    %c0_88 = arith.constant 0 : index
    %c0_89 = arith.constant 0 : index
    %199 = vector.load %arg7[%c1_87, %c0_88, %c0_89] : memref<2x16x16xf32, #tpu.memory_space<vmem>>, vector<1x8x1xf32>
    %200 = vector.shape_cast %199 : vector<1x8x1xf32> to vector<8x1xf32>
    %201 = vector.shape_cast %198 : vector<8x1xf32> to vector<1x8x1xf32>
    tpu.vector_store %arg7[%c1_87, %c0_88, %c0_89], %201 {strides = array<i32>} : memref<2x16x16xf32, #tpu.memory_space<vmem>>, vector<1x8x1xf32>,
    %202 = vector.extract_strided_slice %195 {offsets = [0, 2], sizes = [8, 1], strides = [1, 1]} : vector<8x16xf32> to vector<8x1xf32>
    %203 = vector.extract_strided_slice %195 {offsets = [0, 3], sizes = [8, 1], strides = [1, 1]} : vector<8x16xf32> to vector<8x1xf32>
    %204 = arith.maximumf %202, %203 : vector<8x1xf32>
    %c1_90 = arith.constant 1 : index
    %c0_91 = arith.constant 0 : index
    %c1_92 = arith.constant 1 : index
    %205 = vector.load %arg7[%c1_90, %c0_91, %c1_92] : memref<2x16x16xf32, #tpu.memory_space<vmem>>, vector<1x8x1xf32>
    %206 = vector.shape_cast %205 : vector<1x8x1xf32> to vector<8x1xf32>
    %207 = vector.shape_cast %204 : vector<8x1xf32> to vector<1x8x1xf32>
    tpu.vector_store %arg7[%c1_90, %c0_91, %c1_92], %207 {strides = array<i32>} : memref<2x16x16xf32, #tpu.memory_space<vmem>>, vector<1x8x1xf32>,
    %208 = vector.extract_strided_slice %195 {offsets = [0, 4], sizes = [8, 1], strides = [1, 1]} : vector<8x16xf32> to vector<8x1xf32>
    %209 = vector.extract_strided_slice %195 {offsets = [0, 5], sizes = [8, 1], strides = [1, 1]} : vector<8x16xf32> to vector<8x1xf32>
    %210 = arith.maximumf %208, %209 : vector<8x1xf32>
    %c1_93 = arith.constant 1 : index
    %c0_94 = arith.constant 0 : index
    %c2_95 = arith.constant 2 : index
    %211 = vector.load %arg7[%c1_93, %c0_94, %c2_95] : memref<2x16x16xf32, #tpu.memory_space<vmem>>, vector<1x8x1xf32>
    %212 = vector.shape_cast %211 : vector<1x8x1xf32> to vector<8x1xf32>
    %213 = vector.shape_cast %210 : vector<8x1xf32> to vector<1x8x1xf32>
    tpu.vector_store %arg7[%c1_93, %c0_94, %c2_95], %213 {strides = array<i32>} : memref<2x16x16xf32, #tpu.memory_space<vmem>>, vector<1x8x1xf32>,
    %214 = vector.extract_strided_slice %195 {offsets = [0, 6], sizes = [8, 1], strides = [1, 1]} : vector<8x16xf32> to vector<8x1xf32>
    %215 = vector.extract_strided_slice %195 {offsets = [0, 7], sizes = [8, 1], strides = [1, 1]} : vector<8x16xf32> to vector<8x1xf32>
    %216 = arith.maximumf %214, %215 : vector<8x1xf32>
    %c1_96 = arith.constant 1 : index
    %c0_97 = arith.constant 0 : index
    %c3_98 = arith.constant 3 : index
    %217 = vector.load %arg7[%c1_96, %c0_97, %c3_98] : memref<2x16x16xf32, #tpu.memory_space<vmem>>, vector<1x8x1xf32>
    %218 = vector.shape_cast %217 : vector<1x8x1xf32> to vector<8x1xf32>
    %219 = vector.shape_cast %216 : vector<8x1xf32> to vector<1x8x1xf32>
    tpu.vector_store %arg7[%c1_96, %c0_97, %c3_98], %219 {strides = array<i32>} : memref<2x16x16xf32, #tpu.memory_space<vmem>>, vector<1x8x1xf32>,
    %220 = vector.extract_strided_slice %195 {offsets = [0, 8], sizes = [8, 1], strides = [1, 1]} : vector<8x16xf32> to vector<8x1xf32>
    %221 = vector.extract_strided_slice %195 {offsets = [0, 9], sizes = [8, 1], strides = [1, 1]} : vector<8x16xf32> to vector<8x1xf32>
    %222 = arith.maximumf %220, %221 : vector<8x1xf32>
    %c1_99 = arith.constant 1 : index
    %c0_100 = arith.constant 0 : index
    %c4_101 = arith.constant 4 : index
    %223 = vector.load %arg7[%c1_99, %c0_100, %c4_101] : memref<2x16x16xf32, #tpu.memory_space<vmem>>, vector<1x8x1xf32>
    %224 = vector.shape_cast %223 : vector<1x8x1xf32> to vector<8x1xf32>
    %225 = vector.shape_cast %222 : vector<8x1xf32> to vector<1x8x1xf32>
    tpu.vector_store %arg7[%c1_99, %c0_100, %c4_101], %225 {strides = array<i32>} : memref<2x16x16xf32, #tpu.memory_space<vmem>>, vector<1x8x1xf32>,
    %226 = vector.extract_strided_slice %195 {offsets = [0, 10], sizes = [8, 1], strides = [1, 1]} : vector<8x16xf32> to vector<8x1xf32>
    %227 = vector.extract_strided_slice %195 {offsets = [0, 11], sizes = [8, 1], strides = [1, 1]} : vector<8x16xf32> to vector<8x1xf32>
    %228 = arith.maximumf %226, %227 : vector<8x1xf32>
    %c1_102 = arith.constant 1 : index
    %c0_103 = arith.constant 0 : index
    %c5_104 = arith.constant 5 : index
    %229 = vector.load %arg7[%c1_102, %c0_103, %c5_104] : memref<2x16x16xf32, #tpu.memory_space<vmem>>, vector<1x8x1xf32>
    %230 = vector.shape_cast %229 : vector<1x8x1xf32> to vector<8x1xf32>
    %231 = vector.shape_cast %228 : vector<8x1xf32> to vector<1x8x1xf32>
    tpu.vector_store %arg7[%c1_102, %c0_103, %c5_104], %231 {strides = array<i32>} : memref<2x16x16xf32, #tpu.memory_space<vmem>>, vector<1x8x1xf32>,
    %232 = vector.extract_strided_slice %195 {offsets = [0, 12], sizes = [8, 1], strides = [1, 1]} : vector<8x16xf32> to vector<8x1xf32>
    %233 = vector.extract_strided_slice %195 {offsets = [0, 13], sizes = [8, 1], strides = [1, 1]} : vector<8x16xf32> to vector<8x1xf32>
    %234 = arith.maximumf %232, %233 : vector<8x1xf32>
    %c1_105 = arith.constant 1 : index
    %c0_106 = arith.constant 0 : index
    %c6_107 = arith.constant 6 : index
    %235 = vector.load %arg7[%c1_105, %c0_106, %c6_107] : memref<2x16x16xf32, #tpu.memory_space<vmem>>, vector<1x8x1xf32>
    %236 = vector.shape_cast %235 : vector<1x8x1xf32> to vector<8x1xf32>
    %237 = vector.shape_cast %234 : vector<8x1xf32> to vector<1x8x1xf32>
    tpu.vector_store %arg7[%c1_105, %c0_106, %c6_107], %237 {strides = array<i32>} : memref<2x16x16xf32, #tpu.memory_space<vmem>>, vector<1x8x1xf32>,
    %238 = vector.extract_strided_slice %195 {offsets = [0, 14], sizes = [8, 1], strides = [1, 1]} : vector<8x16xf32> to vector<8x1xf32>
    %239 = vector.extract_strided_slice %195 {offsets = [0, 15], sizes = [8, 1], strides = [1, 1]} : vector<8x16xf32> to vector<8x1xf32>
    %240 = arith.maximumf %238, %239 : vector<8x1xf32>
    %c1_108 = arith.constant 1 : index
    %c0_109 = arith.constant 0 : index
    %c7_110 = arith.constant 7 : index
    %241 = vector.load %arg7[%c1_108, %c0_109, %c7_110] : memref<2x16x16xf32, #tpu.memory_space<vmem>>, vector<1x8x1xf32>
    %242 = vector.shape_cast %241 : vector<1x8x1xf32> to vector<8x1xf32>
    %243 = vector.shape_cast %240 : vector<8x1xf32> to vector<1x8x1xf32>
    tpu.vector_store %arg7[%c1_108, %c0_109, %c7_110], %243 {strides = array<i32>} : memref<2x16x16xf32, #tpu.memory_space<vmem>>, vector<1x8x1xf32>,
    %c1_111 = arith.constant 1 : index
    %c0_112 = arith.constant 0 : index
    %c0_113 = arith.constant 0 : index
    %244 = vector.load %arg7[%c1_111, %c0_112, %c0_113] : memref<2x16x16xf32, #tpu.memory_space<vmem>>, vector<1x8x8xf32>
    %245 = vector.shape_cast %244 : vector<1x8x8xf32> to vector<8x8xf32>
    %cst = arith.constant 0.000000e+00 : f32
    %246 = vector.broadcast %cst : f32 to vector<8x8xf32>
    %247 = arith.maximumf %145, %246 : vector<8x8xf32>
    %248 = vector.shape_cast %247 : vector<8x8xf32> to vector<1x8x8xf32>
    %cst_114 = arith.constant dense<0.000000e+00> : vector<1xf32>
    %249 = vector.multi_reduction <add>, %248, %cst_114 [1, 2] : vector<1x8x8xf32> to vector<1xf32>
    %250 = vector.shape_cast %249 : vector<1xf32> to vector<1x1x1xf32>
    %251 = vector.extract %250[0, 0, 0] : f32 from vector<1x1x1xf32>
    %252 = vector.broadcast %251 : f32 to vector<1x1xf32>
    %cst_115 = arith.constant 6.400000e+01 : f32
    %253 = vector.broadcast %cst_115 : f32 to vector<1x1xf32>
    %254 = arith.divf %252, %253 : vector<1x1xf32>
    %255 = vector.broadcast %254 : vector<1x1xf32> to vector<8x8xf32>
    %256 = arith.subf %247, %255 : vector<8x8xf32>
    %257 = arith.mulf %256, %256 : vector<8x8xf32>
    %258 = vector.shape_cast %257 : vector<8x8xf32> to vector<1x8x8xf32>
    %cst_116 = arith.constant dense<0.000000e+00> : vector<1xf32>
    %259 = vector.multi_reduction <add>, %258, %cst_116 [1, 2] : vector<1x8x8xf32> to vector<1xf32>
    %260 = vector.shape_cast %259 : vector<1xf32> to vector<1x1x1xf32>
    %261 = vector.extract %260[0, 0, 0] : f32 from vector<1x1x1xf32>
    %262 = vector.broadcast %261 : f32 to vector<1x1xf32>
    %cst_117 = arith.constant 6.400000e+01 : f32
    %263 = vector.broadcast %cst_117 : f32 to vector<1x1xf32>
    %264 = arith.divf %262, %263 : vector<1x1xf32>
    %cst_118 = arith.constant 9.99999974E-6 : f32
    %265 = vector.broadcast %cst_118 : f32 to vector<1x1xf32>
    %266 = arith.addf %264, %265 : vector<1x1xf32>
    %267 = math.rsqrt %266 : vector<1x1xf32>
    %268 = vector.broadcast %267 : vector<1x1xf32> to vector<8x8xf32>
    %269 = arith.mulf %256, %268 : vector<8x8xf32>
    %cst_119 = arith.constant 0.000000e+00 : f32
    %270 = vector.broadcast %cst_119 : f32 to vector<8x8xf32>
    %271 = arith.maximumf %245, %270 : vector<8x8xf32>
    %272 = vector.shape_cast %271 : vector<8x8xf32> to vector<1x8x8xf32>
    %cst_120 = arith.constant dense<0.000000e+00> : vector<1xf32>
    %273 = vector.multi_reduction <add>, %272, %cst_120 [1, 2] : vector<1x8x8xf32> to vector<1xf32>
    %274 = vector.shape_cast %273 : vector<1xf32> to vector<1x1x1xf32>
    %275 = vector.extract %274[0, 0, 0] : f32 from vector<1x1x1xf32>
    %276 = vector.broadcast %275 : f32 to vector<1x1xf32>
    %cst_121 = arith.constant 6.400000e+01 : f32
    %277 = vector.broadcast %cst_121 : f32 to vector<1x1xf32>
    %278 = arith.divf %276, %277 : vector<1x1xf32>
    %279 = vector.broadcast %278 : vector<1x1xf32> to vector<8x8xf32>
    %280 = arith.subf %271, %279 : vector<8x8xf32>
    %281 = arith.mulf %280, %280 : vector<8x8xf32>
    %282 = vector.shape_cast %281 : vector<8x8xf32> to vector<1x8x8xf32>
    %cst_122 = arith.constant dense<0.000000e+00> : vector<1xf32>
    %283 = vector.multi_reduction <add>, %282, %cst_122 [1, 2] : vector<1x8x8xf32> to vector<1xf32>
    %284 = vector.shape_cast %283 : vector<1xf32> to vector<1x1x1xf32>
    %285 = vector.extract %284[0, 0, 0] : f32 from vector<1x1x1xf32>
    %286 = vector.broadcast %285 : f32 to vector<1x1xf32>
    %cst_123 = arith.constant 6.400000e+01 : f32
    %287 = vector.broadcast %cst_123 : f32 to vector<1x1xf32>
    %288 = arith.divf %286, %287 : vector<1x1xf32>
    %cst_124 = arith.constant 9.99999974E-6 : f32
    %289 = vector.broadcast %cst_124 : f32 to vector<1x1xf32>
    %290 = arith.addf %288, %289 : vector<1x1xf32>
    %291 = math.rsqrt %290 : vector<1x1xf32>
    %292 = vector.broadcast %291 : vector<1x1xf32> to vector<8x8xf32>
    %293 = arith.mulf %280, %292 : vector<8x8xf32>
    %c0_125 = arith.constant 0 : index
    %294 = memref.load %arg3[%c0_125] : memref<2xf32, #tpu.memory_space<smem>>
    %295 = vector.broadcast %294 : f32 to vector<8x8xf32>
    %296 = arith.mulf %269, %295 : vector<8x8xf32>
    %c0_126 = arith.constant 0 : index
    %297 = memref.load %arg4[%c0_126] : memref<1xf32, #tpu.memory_space<smem>>
    %298 = vector.broadcast %297 : f32 to vector<8x8xf32>
    %299 = arith.addf %296, %298 : vector<8x8xf32>
    %c1_127 = arith.constant 1 : index
    %300 = memref.load %arg3[%c1_127] : memref<2xf32, #tpu.memory_space<smem>>
    %301 = vector.broadcast %300 : f32 to vector<8x8xf32>
    %302 = arith.mulf %293, %301 : vector<8x8xf32>
    %303 = arith.addf %299, %302 : vector<8x8xf32>
    %cst_128 = arith.constant 0.000000e+00 : f32
    %304 = vector.broadcast %cst_128 : f32 to vector<8x8xf32>
    %305 = arith.maximumf %303, %304 : vector<8x8xf32>
    %306 = vector.shape_cast %305 : vector<8x8xf32> to vector<1x8x8xf32>
    %cst_129 = arith.constant dense<0.000000e+00> : vector<1xf32>
    %307 = vector.multi_reduction <add>, %306, %cst_129 [1, 2] : vector<1x8x8xf32> to vector<1xf32>
    %308 = vector.shape_cast %307 : vector<1xf32> to vector<1x1x1xf32>
    %309 = vector.extract %308[0, 0, 0] : f32 from vector<1x1x1xf32>
    %310 = vector.broadcast %309 : f32 to vector<1x1xf32>
    %cst_130 = arith.constant 6.400000e+01 : f32
    %311 = vector.broadcast %cst_130 : f32 to vector<1x1xf32>
    %312 = arith.divf %310, %311 : vector<1x1xf32>
    %313 = vector.broadcast %312 : vector<1x1xf32> to vector<8x8xf32>
    %314 = arith.subf %305, %313 : vector<8x8xf32>
    %315 = arith.mulf %314, %314 : vector<8x8xf32>
    %316 = vector.shape_cast %315 : vector<8x8xf32> to vector<1x8x8xf32>
    %cst_131 = arith.constant dense<0.000000e+00> : vector<1xf32>
    %317 = vector.multi_reduction <add>, %316, %cst_131 [1, 2] : vector<1x8x8xf32> to vector<1xf32>
    %318 = vector.shape_cast %317 : vector<1xf32> to vector<1x1x1xf32>
    %319 = vector.extract %318[0, 0, 0] : f32 from vector<1x1x1xf32>
    %320 = vector.broadcast %319 : f32 to vector<1x1xf32>
    %cst_132 = arith.constant 6.400000e+01 : f32
    %321 = vector.broadcast %cst_132 : f32 to vector<1x1xf32>
    %322 = arith.divf %320, %321 : vector<1x1xf32>
    %cst_133 = arith.constant 9.99999974E-6 : f32
    %323 = vector.broadcast %cst_133 : f32 to vector<1x1xf32>
    %324 = arith.addf %322, %323 : vector<1x1xf32>
    %325 = math.rsqrt %324 : vector<1x1xf32>
    %326 = vector.broadcast %325 : vector<1x1xf32> to vector<8x8xf32>
    %327 = arith.mulf %314, %326 : vector<8x8xf32>
    %328 = tpu.transpose %327, [1, 0] : vector<8x8xf32> -> vector<8x8xf32>
    %329 = arith.addf %327, %328 : vector<8x8xf32>
    %330 = vector.shape_cast %329 : vector<8x8xf32> to vector<1x8x8xf32>
    %cst_134 = arith.constant dense<0xFF800000> : vector<1xf32>
    %331 = vector.multi_reduction <maximumf>, %330, %cst_134 [1, 2] : vector<1x8x8xf32> to vector<1xf32>
    %332 = vector.shape_cast %331 : vector<1xf32> to vector<1x1x1xf32>
    %333 = vector.extract %332[0, 0, 0] : f32 from vector<1x1x1xf32>
    %334 = vector.broadcast %333 : f32 to vector<1x1xf32>
    %335 = vector.broadcast %334 : vector<1x1xf32> to vector<8x8xf32>
    %336 = arith.subf %329, %335 : vector<8x8xf32>
    %337 = math.exp %336 : vector<8x8xf32>
    %338 = vector.shape_cast %337 : vector<8x8xf32> to vector<1x8x8xf32>
    %cst_135 = arith.constant dense<0.000000e+00> : vector<1xf32>
    %339 = vector.multi_reduction <add>, %338, %cst_135 [1, 2] : vector<1x8x8xf32> to vector<1xf32>
    %340 = vector.shape_cast %339 : vector<1xf32> to vector<1x1x1xf32>
    %341 = vector.extract %340[0, 0, 0] : f32 from vector<1x1x1xf32>
    %342 = vector.broadcast %341 : f32 to vector<1x1xf32>
    %343 = tpu.reciprocal %342 : vector<1x1xf32> -> vector<1x1xf32>
    %344 = vector.broadcast %343 : vector<1x1xf32> to vector<8x8xf32>
    %345 = arith.mulf %337, %344 : vector<8x8xf32>
    %c0_136 = arith.constant 0 : index
    %c0_137 = arith.constant 0 : index
    %c0_138 = arith.constant 0 : index
    %346 = vector.load %arg6[%c0_136, %c0_137, %c0_138] : memref<1x8x8xf32, #tpu.memory_space<vmem>>, vector<1x8x8xf32>
    %347 = vector.shape_cast %346 : vector<1x8x8xf32> to vector<8x8xf32>
    %348 = vector.shape_cast %345 : vector<8x8xf32> to vector<1x8x8xf32>
    tpu.vector_store %arg6[%c0_136, %c0_137, %c0_138], %348 {strides = array<i32>} : memref<1x8x8xf32, #tpu.memory_space<vmem>>, vector<1x8x8xf32>,
    return
  }
  func.func @transform_0(%arg0: i32) -> i32 {
    %c0_i32 = arith.constant 0 : i32
    %c0_i32_0 = arith.constant 0 : i32
    return %c0_i32 : i32
  }
  func.func @transform_1(%arg0: i32) -> i32 {
    %c0_i32 = arith.constant 0 : i32
    %c0_i32_0 = arith.constant 0 : i32
    return %c0_i32 : i32
  }
  func.func @transform_2(%arg0: i32) -> i32 {
    %c0_i32 = arith.constant 0 : i32
    %c0_i32_0 = arith.constant 0 : i32
    return %c0_i32 : i32
  }
  func.func @transform_3(%arg0: i32) -> i32 {
    %c0_i32 = arith.constant 0 : i32
    %c0_i32_0 = arith.constant 0 : i32
    return %c0_i32 : i32
  }
  func.func @transform_4(%arg0: i32) -> (i32, i32, i32, i32) {
    %c0_i32 = arith.constant 0 : i32
    %c0_i32_0 = arith.constant 0 : i32
    %c0_i32_1 = arith.constant 0 : i32
    %c0_i32_2 = arith.constant 0 : i32
    return %arg0, %c0_i32, %c0_i32_0, %c0_i32_1 : i32, i32, i32, i32
  }
  func.func @transform_5(%arg0: i32) -> (i32, i32, i32) {
    %c0_i32 = arith.constant 0 : i32
    %c0_i32_0 = arith.constant 0 : i32
    %c0_i32_1 = arith.constant 0 : i32
    return %arg0, %c0_i32, %c0_i32_0 : i32, i32, i32
  }
}

</mosaic_0001>

<bundles_post_ra>
// kernel: tpu_custom_call.1
= control target key start
LH: loop header
LB: loop body
LE: loop exit
PB: predicated region body
PF: predicated region fallthrough
CT: control target
= control target key end

     0   :  { %s1351_s0 = inlined_call_operand.vmem [shape: f32[8], index: 0, kind: input, shape index: {}]   ;;  %s1352_s1 = inlined_call_operand.vmem [shape: f32[2], index: 1, kind: input, shape index: {}]   ;;  %s1353_s2 = inlined_call_operand.vmem [shape: f32[2], index: 2, kind: input, shape index: {}]   ;;  %s1354_s3 = inlined_call_operand.<no memory space> [shape: f32[1], index: 3, kind: input, shape index: {}]   ;;  %s1355_s4 = inlined_call_operand.hbm [shape: f32[2,4,16,16], index: 4, kind: input, shape index: {}]   ;;  %s1356_s5 = inlined_call_operand.hbm [shape: f32[2,8,8], index: 5, kind: output, shape index: {}]  }
   0x1   :  { %10 = sst [smem:[#allocation3]] %s1354_s3 }
   0x2   :  { %11 = vsyncpa [#allocation7], 0 }
   0x3   :  { %12 = vsyncpa [#allocation9], 0 }
   0x4   :  { %13 = vsyncpa [#allocation5], 0 }
   0x5   :  { %15 = vsyncpa [#allocation5 + $0x1], 0 }
   0x6   :  { %16 = vsyncpa [#allocation6], 0 }
   0x7   :  { %18 = vsyncpa [#allocation6 + $0x1], 0  ;;  %s1080_s20 = smov 0   ;;  %s1082_s21 = smov 0  }
   0x8   :  { %s1084_s22 = smov 0   ;;  %s1086_s23 = smov 0  }
   0x9 LB: > { %s1101_s3 = sadd.s32 4294967295, %s1031_s23   ;;  %s740_s24 = sadd.s32 4294967294, %s1031_s23   ;;  %s1031_s23 = sphi %s1086_s23, %s1378_s23   ;;  %s1027_s22 = sphi %s1084_s22, %s1377_s22   ;;  %s1023_s21 = sphi %s1082_s21, %s1376_s21   ;;  %s1019_s20 = sphi %s1080_s20, %s1375_s20  }
   0xa   : > { %p128_p0 = scmp.ne.s32.totalorder %s1023_s21, %s1019_s20  ;;  %p1357_p1 = scmp.eq.s32.totalorder %s1101_s3, 0 }
   0xb   : > { %p158_p3 = scmp.eq.s32.totalorder %s740_s24, 1  ;;  %p741_p5 = scmp.ge.s32.totalorder %s1031_s23, 1 }
   0xc   : > { %p1110_p4 = por %p1357_p1, %p128_p0  ;;  %p165_p7 = scmp.lt.s32.totalorder %s1031_s23, 3 }
   0xd   : > { %p1115_p6 = por %p158_p3, %p128_p0  ;;  %s189_s29 = sshll.u32 %s1352_s1, 4  ;;  %s190_s29 = int_to_ptr.vmem [resolvable:$true] %s189_s29 }
   0xe   : > { %s1360_s25 = scalar_select %p1110_p4, 1, 0 }
   0xf   : > { %s1361_s26 = scalar_select %p1115_p6, 1, 0 }
  0x10   : > { %p1123_p8 = pnand %p741_p5, %p165_p7  ;;  %s178_s8 = sshll.u32 %s1351_s0, 4  ;;  %s179_s8 = int_to_ptr.vmem [resolvable:$true] %s178_s8 }
  0x11   : > { %s200_s12 = sshll.u32 %s1353_s2, 4  ;;  %s882_s13 = scalar_lea.vmem %s190_s29, 16  ;;  %s1142_s12 = int_to_ptr.vmem [resolvable:$true] %s200_s12 }
  0x12   : > { %s1362_s30 = scalar_select %p1123_p8, 1, 0 }
  0x13   : > { %p801_p10 = pneg %p1123_p8  ;;  %p883_p12 = scmp.ne.s32.totalorder %s190_s29, %s882_s13 }
  0x14   : > { %p890_p5 = scmp.lt.s32.totalorder %s190_s29, %s190_s29  ;;  %p891_p7 = scmp.lt.s32.totalorder %s882_s13, %s882_s13 }
  0x15   : > { %p1135_p11 = pnand %p801_p10, %p1357_p1 }
  0x16   : > { %p892_p10 = por %p891_p7, %p890_p5 }
  0x17   : > { %p884_p13 = pneg %p1135_p11 }
  0x19   : > { %p885_p0 = pnand %p884_p13, %p883_p12 }
  0x1b   : > { %p886_p3 = pneg %p885_p0 }
  0x1d   : > { %p893_p9 = pnand %p892_p10, %p886_p3 }
  0x1f   : > { %896 = shalt.err (!%p893_p9)
}
  0x20   : > { %s1033_s14 = smov [#allocation8]   ;;  %s897_s15 = scalar_lea.vmem %s179_s8, 16 }
  0x21   : > { %807 = dma.vmem_to_smem (!%p1135_p11), %s190_s29, 16, %s1033_s14, [#allocation9]  }
  0x22   : > { %p898_p1 = scmp.ne.s32.totalorder %s179_s8, %s897_s15  ;;  %p905_p4 = scmp.lt.s32.totalorder %s179_s8, %s179_s8 }
  0x23   : > { %p906_p8 = scmp.lt.s32.totalorder %s897_s15, %s897_s15 }
  0x24   : > { %p900_p2 = pnand %p898_p1, %p884_p13 }
  0x25   : > { %p907_p12 = por %p906_p8, %p905_p4 }
  0x26   : > { %p901_p6 = pneg %p900_p2 }
  0x28   : > { %p908_p0 = pnand %p907_p12, %p901_p6 }
  0x2a   : > { %911 = shalt.err (!%p908_p0)
}
  0x2b   : > { %s1034_s16 = smov [#allocation4]   ;;  %s912_s17 = scalar_lea.vmem %s1142_s12, 16 }
  0x2c   : > { %804 = dma.vmem_to_smem (!%p1135_p11), %s179_s8, 16, %s1034_s16, [#allocation7]  }
  0x2d   : > { %p913_p9 = scmp.ne.s32.totalorder %s1142_s12, %s912_s17  ;;  %p920_p2 = scmp.lt.s32.totalorder %s1142_s12, %s1142_s12 }
  0x2e   : > { %p921_p5 = scmp.lt.s32.totalorder %s912_s17, %s912_s17 }
  0x2f   : > { %p915_p3 = pnand %p913_p9, %p884_p13 }
  0x30   : > { %p922_p4 = por %p921_p5, %p920_p2 }
  0x31   : > { %p916_p1 = pneg %p915_p3 }
  0x33   : > { %p923_p6 = pnand %p922_p4, %p916_p1 }
  0x35   : > { %926 = shalt.err (!%p923_p6)
}
  0x36   : > { %s1035_s18 = smov [#allocation10]   ;;  %s1167_s19 = sadd.s32 1, %s1031_s23  }
  0x37   : > { %810 = dma.vmem_to_smem (!%p1135_p11), %s1142_s12, 16, %s1035_s18, [#allocation9]  }
  0x38   : > { %s112_s24 = ssub.s32 %s1031_s23, %s1167_s19  ;;  %s115_s27 = sadd.s32 1, %s1027_s22 }
  0x39   : > { %p113_p8 = scmp.eq.s32.totalorder %s112_s24, 0  ;;  %p122_p13 = scmp.ne.s32.totalorder %s1027_s22, %s1023_s21 }
  0x3a   : > { %p123_p7 = scmp.eq.s32.totalorder %s1031_s23, 0  ;;  %p822_p10 = scmp.lt.s32.totalorder %s1031_s23, 2 }
  0x3b   : > { %s1177_s28 = scalar_select %p113_p8, %s1027_s22, %s115_s27  }
  0x3c   : > { %p124_p12 = por %p123_p7, %p122_p13  ;;  %p1364_p0 = scmp.eq.s32.totalorder %s1101_s3, 1 }
  0x3d   : > { %s214_s6 = sand.u32 1, %s1027_s22   ;;  %s768_s7 = sshll.u32 %s1031_s23, 10 }
  0x3e   : > { %p1181_p9 = por %p1364_p0, %p122_p13  ;;  %s746_s8 = sshll.u32 %s214_s6, 6 }
  0x3f   : > { %s1190_s11 = scalar_lea.hbm %s1355_s4, %s768_s7  ;;  %s218_s12 = scalar_lea.vmem [#allocation11], %s746_s8 }
  0x40   : > { %s225_s13 = sshll.u32 %s218_s12, 4  ;;  %p1192_p11 = pnand %p822_p10, %p124_p12  ;;  %s1196_s13 = int_to_ptr.vmem [resolvable:$true] %s225_s13 }
  0x41   : > { %s1198_s15 = scalar_lea.sflag [#allocation5], %s214_s6  ;;  %s927_s16 = scalar_lea.hbm %s1190_s11, 1024 }
  0x42   : > { %p928_p3 = scmp.ne.s32.totalorder %s1190_s11, %s927_s16  ;;  %p929_p1 = pneg %p1192_p11 }
  0x43   : > { %s932_s24 = scalar_lea.hbm %s1355_s4, 2048  ;;  %p933_p4 = scmp.lt.u32.totalorder %s1190_s11, %s1355_s4 }
  0x44   : > { %p930_p2 = pnand %p929_p1, %p928_p3  ;;  %p934_p6 = scmp.lt.u32.totalorder %s932_s24, %s927_s16 }
  0x45   : > { %p936_p13 = scmp.lt.u32.totalorder %s927_s16, %s1190_s11 }
  0x46   : > { %p931_p5 = pneg %p930_p2  ;;  %p935_p8 = por %p934_p6, %p933_p4 }
  0x48   : > { %p937_p7 = por %p936_p13, %p935_p8 }
  0x4a   : > { %p938_p10 = pnand %p937_p7, %p931_p5 }
  0x4c   : > { %941 = shalt.err (!%p938_p10)
}
  0x4d   : > { %s942_s6 = scalar_lea.vmem %s1196_s13, 1024  ;;  %s1036_s8 = smov [#allocation11]  }
  0x4e   : > { %p943_p12 = scmp.ne.s32.totalorder %s1196_s13, %s942_s6  ;;  %s947_s9 = sshll.u32 %s1036_s8, 4  ;;  %s948_s9 = int_to_ptr.vmem [resolvable:$false] %s947_s9 }
  0x4f   : > { %s949_s10 = scalar_lea.vmem %s948_s9, 2048  ;;  %p950_p2 = scmp.lt.s32.totalorder %s1196_s13, %s948_s9 }
  0x50   : > { %p945_p0 = pnand %p943_p12, %p929_p1  ;;  %p951_p4 = scmp.lt.s32.totalorder %s949_s10, %s942_s6 }
  0x52   : > { %p946_p3 = pneg %p945_p0  ;;  %p952_p6 = por %p951_p4, %p950_p2 }
  0x54   : > { %p953_p8 = pnand %p952_p6, %p946_p3 }
  0x56   : > { %956 = shalt.err (!%p953_p8)
}
  0x57   : > { %s1037_s12 = smov 128   ;;  %s1038_s16 = smov 8  }
  0x58   : > { %814 = dma.hbm_to_vmem [thread:$0]  (!%p1192_p11), %s1190_s11, 1024, %s1196_s13, %s1198_s15, %s1037_s12, %s1037_s12, %s1038_s16  }
  0x59   : > { %p1367_p1 = scmp.ne.s32.totalorder %s1362_s30, 0 }
  0x5a   : > { %p1368_p5 = scmp.eq.s32.totalorder (!%p1367_p1), %s1101_s3, 0 }
  0x5b   : > { %237 = sbr.rel (%p1367_p1) target bundleno = 2068 (0x814), region = 40 }
  0x62   : > { %1002 = dma.done.wait (%p1368_p5), [#allocation7], 16   ;;  %p1369_p13 = pmov %p1368_p5 }
  0x63   : > { %p1370_p7 = pmov %p1368_p5 }
  0x64   : > { %1004 = vsyncadd (%p1369_p13), [#allocation7], 4294967280 }
  0x65   : > { %1006 = dma.done.wait (%p1370_p7), [#allocation9], 32   ;;  %p1371_p10 = pmov %p1368_p5 }
  0x66   : > { %s1237_s17 = sand.u32 1, %s1023_s21   ;;  %p1372_p11 = scmp.ne.s32.totalorder %s1360_s25, 0 }
  0x67   : > { %1008 = vsyncadd (%p1371_p10), [#allocation9], 4294967264  ;;  %s753_s30 = sshll.u32 %s1237_s17, 6  ;;  %s252_s11 = scalar_lea.sflag [#allocation5], %s1237_s17 }
  0x68   : > { %s255_s13 = scalar_lea.vmem [#allocation11], %s753_s30 }
  0x69   : > { %1010 = dma.done.wait (%p1372_p11), %s252_s11, 1024  }
  0x6a   : > { %1012 = vsyncadd (%p1372_p11), %s252_s11, 4294966272 }
  0x6b   : > { %260 = sfence }
  0x6c   : > { %s291_s14 = sld [smem:[#allocation4]]  ;;  %s755_s18 = sld [smem:[#allocation4 + $0x1]]  ;;  %v283_v0 = vld [vmem:[%s255_s13] sm:$0xff]  ;;  %v284_v1 = vld [vmem:[%s255_s13 + $0x8] sm:$0xff]  ;;  %v285_v2 = vld [vmem:[%s255_s13 + $0x10] sm:$0xff]  ;;  %vm347_vm0 = vcmask 122880  }
  0x6d   : > { %s295_s15 = sld [smem:[#allocation8]]  ;;  %s756_s24 = sld [smem:[#allocation4 + $0x2]]  ;;  %v286_v3 = vld [vmem:[%s255_s13 + $0x18] sm:$0xff]  ;;  %v287_v5 = vld [vmem:[%s255_s13 + $0x20] sm:$0xff]  ;;  %v288_v6 = vld [vmem:[%s255_s13 + $0x28] sm:$0xff]  ;;  %vm349_vm1 = vcmask 124930  }
  0x6e   : > { %s757_s27 = sld [smem:[#allocation4 + $0x3]]  ;;  %v289_v10 = vld [vmem:[%s255_s13 + $0x30] sm:$0xff]  ;;  %v290_v11 = vld [vmem:[%s255_s13 + $0x38] sm:$0xff]  ;;  %vm351_vm2 = vcmask 126980   ;;  %vm353_vm3 = vcmask 129030   ;;  %s1039_s25 = smov 127  }
  0x6f   : > { %s758_s7 = sld [smem:[#allocation4 + $0x4]]  ;;  %s759_s6 = sld [smem:[#allocation8 + $0x1]]  ;;  %vm369_vm4 = vcmask 7168   ;;  %vm375_vm5 = vcmask 15368   ;;  %vm380_vm6 = vcmask 23568   ;;  %vm385_vm7 = vcmask 31768  }
  0x70   : > { %s760_s8 = sld [smem:[#allocation4 + $0x5]]  ;;  %s761_s9 = sld [smem:[#allocation4 + $0x6]]  ;;  %vm390_vm8 = vcmask 39968   ;;  %vm395_vm9 = vcmask 48168   ;;  %vm400_vm10 = vcmask 56368   ;;  %vm405_vm11 = vcmask 64568  }
  0x71   : > { %s762_s10 = sld [smem:[#allocation4 + $0x7]]  ;;  %s1040_s12 = smov 126   ;;  %vm463_vm12 = vcmask 64512  }
  0x72   : > { %v292_v4 = vstv %s291_s14  ;;  %v300_v12 = vstv %s755_s18  ;;  %s1041_s16 = smov 125   ;;  %s1042_s30 = smov 124  }
  0x73   : > { %v293_v7 = vmul.f32 %v292_v4, %v283_v0  ;;  %v294_v8 = vmul.f32 %v292_v4, %v284_v1  ;;  %v296_v9 = vstv %s295_s15  ;;  %v306_v13 = vstv %s756_s24  ;;  %s1043_s11 = smov 123   ;;  %s1044_s13 = smov 122  }
  0x74   : > { %v301_v16 = vmul.f32 %v300_v12, %v285_v2  ;;  %v302_v17 = vmul.f32 %v300_v12, %v286_v3  ;;  %v307_v18 = vmul.f32 %v306_v13, %v287_v5  ;;  %v308_v19 = vmul.f32 %v306_v13, %v288_v6  ;;  %s1045_s14 = smov 121  }
  0x75   : > { %v297_v14 = vadd.f32 %v296_v9, %v293_v7  ;;  %v298_v15 = vadd.f32 %v296_v9, %v294_v8  ;;  %v312_v20 = vstv %s757_s27  ;;  %v318_v34 = vstv %s758_s7  ;;  %s527_s7 = sld [smem:[#allocation3]] }
  0x76   : > { %v313_v23 = vmul.f32 %v312_v20, %v289_v10  ;;  %v314_v24 = vmul.f32 %v312_v20, %v290_v11  ;;  %v322_v35 = vstv %s759_s6  ;;  %v319_v36 = vmul.f32 %v318_v34, %v283_v0  ;;  %s763_s6 = sld [smem:[#allocation10 + $0x1]] }
  0x77   : > { %v303_v21 = vadd.f32 %v301_v16, %v297_v14  ;;  %v304_v22 = vadd.f32 %v302_v17, %v298_v15  ;;  %v320_v37 = vmul.f32 %v318_v34, %v284_v1  ;;  %v326_v38 = vstv %s760_s8 }
  0x78   : > { %v332_v39 = vstv %s761_s9  ;;  %v327_v40 = vmul.f32 %v326_v38, %v285_v2  ;;  %v328_v41 = vmul.f32 %v326_v38, %v286_v3  ;;  %v323_v43 = vadd.f32 %v322_v35, %v319_v36 }
  0x79   : > { %v309_v25 = vadd.f32 %v307_v18, %v303_v21  ;;  %v310_v26 = vadd.f32 %v308_v19, %v304_v22  ;;  %v333_v42 = vmul.f32 %v332_v39, %v287_v5  ;;  %v324_v44 = vadd.f32 %v322_v35, %v320_v37 }
  0x7a   : > { %v334_v45 = vmul.f32 %v332_v39, %v288_v6  ;;  %v338_v46 = vstv %s762_s10  ;;  %v329_v47 = vadd.f32 %v327_v40, %v323_v43 }
  0x7b   : > { %v315_v27 = vadd.f32 %v313_v23, %v309_v25  ;;  %v316_v28 = vadd.f32 %v314_v24, %v310_v26  ;;  %v330_v48 = vadd.f32 %v328_v41, %v324_v44  ;;  %v339_v49 = vmul.f32 %v338_v46, %v289_v10 }
  0x7c   : > { %v340_v50 = vmul.f32 %v338_v46, %v290_v11  ;;  %v335_v51 = vadd.f32 %v333_v42, %v329_v47 }
  0x7d   : > { %v344_v29 = vrot.slane %v315_v27, 1  ;;  %v356_v30 = vrot.slane %v316_v28, 1  ;;  %v336_v52 = vadd.f32 %v334_v45, %v330_v48 }
  0x7e   : > { %v341_v53 = vadd.f32 %v339_v49, %v335_v51 }
  0x7f   : > { %v346_v31 = vmax.f32 %v315_v27, %v344_v29  ;;  %v358_v32 = vmax.f32 %v316_v28, %v356_v30  ;;  %v342_v54 = vadd.f32 %v340_v50, %v336_v52 }
  0x80   : > { %v409_v55 = vrot.slane %v341_v53, 1 }
  0x81   : > { %348 = vst.msk [vmem:[#allocation2] sm:$0x1] %vm347_vm0, %v346_v31  ;;  %359 = vst.msk [vmem:[#allocation2 + $0x4] sm:$0x1] %vm347_vm0, %v358_v32  ;;  %v418_v56 = vrot.slane %v342_v54, 1 }
  0x82   : > { %350 = vst.msk [vmem:[#allocation2 - $0x1] sm:$0x4] %vm349_vm1, %v346_v31  ;;  %360 = vst.msk [vmem:[#allocation2 + $0x3] sm:$0x4] %vm349_vm1, %v358_v32  ;;  %v411_v57 = vmax.f32 %v341_v53, %v409_v55 }
  0x83   : > { %352 = vst.msk [vmem:[#allocation2 - $0x2] sm:$0x10] %vm351_vm2, %v346_v31  ;;  %361 = vst.msk [vmem:[#allocation2 + $0x2] sm:$0x10] %vm351_vm2, %v358_v32  ;;  %v420_v58 = vmax.f32 %v342_v54, %v418_v56 }
  0x84   : > { %354 = vst.msk [vmem:[#allocation2 - $0x3] sm:$0x40] %vm353_vm3, %v346_v31  ;;  %362 = vst.msk [vmem:[#allocation2 + $0x1] sm:$0x40] %vm353_vm3, %v358_v32 }
  0x85   : > { %413 = vst.msk [vmem:[#allocation2 + $0x10] sm:$0x1] %vm347_vm0, %v411_v57  ;;  %421 = vst.msk [vmem:[#allocation2 + $0x14] sm:$0x1] %vm347_vm0, %v420_v58 }
  0x86   : > { %414 = vst.msk [vmem:[#allocation2 + $0xf] sm:$0x4] %vm349_vm1, %v411_v57  ;;  %422 = vst.msk [vmem:[#allocation2 + $0x13] sm:$0x4] %vm349_vm1, %v420_v58 }
  0x87   : > { %415 = vst.msk [vmem:[#allocation2 + $0xe] sm:$0x10] %vm351_vm2, %v411_v57  ;;  %423 = vst.msk [vmem:[#allocation2 + $0x12] sm:$0x10] %vm351_vm2, %v420_v58 }
  0x88   : > { %416 = vst.msk [vmem:[#allocation2 + $0xd] sm:$0x40] %vm353_vm3, %v411_v57  ;;  %424 = vst.msk [vmem:[#allocation2 + $0x11] sm:$0x40] %vm353_vm3, %v420_v58 }
  0x8b   : > { %v363_v33 = vld [vmem:[#allocation2] sm:$0xff] }
  0x8c   : > { %365 = vrot.lane.b32.xlu0 %v363_v33, %s1039_s25 }
  0x8f   : > { %v425_v61 = vld [vmem:[#allocation2 + $0x10] sm:$0xff] }
  0xfe   : > { %v366_v59 = vpop.permute.xlu0 %365 }
  0xff   : > { %v368_v60 = vmax.f32 %v363_v33, %v366_v59 }
 0x101   : > { %377 = vrot.lane.b32.xlu1 %v368_v60, %s1040_s12  ;;  %372 = vrot.lane.b32.xlu0 %v368_v60, %s1039_s25  ;;  %370 = vst.msk [vmem:[#allocation2] sm:$0xff] %vm369_vm4, %v368_v60 }
 0x105   : > { %382 = vrot.lane.b32.xlu1 %v368_v60, %s1041_s16  ;;  %387 = vrot.lane.b32.xlu0 %v368_v60, %s1042_s30 }
 0x109   : > { %392 = vrot.lane.b32.xlu1 %v368_v60, %s1043_s11  ;;  %397 = vrot.lane.b32.xlu0 %v368_v60, %s1044_s13 }
 0x10d   : > { %402 = vrot.lane.b32.xlu1 %v368_v60, %s1045_s14 }
 0x111   : > { %427 = vrot.lane.b32.xlu1 %v425_v61, %s1039_s25 }
 0x173   : > { %v378_v62 = vpop.permute.xlu1 %377  ;;  %v373_v63 = vpop.permute.xlu0 %372 }
 0x174   : > { %376 = vst.msk [vmem:[#allocation2] sm:$0xff] %vm375_vm5, %v373_v63 }
 0x175   : > { %381 = vst.msk [vmem:[#allocation2] sm:$0xff] %vm380_vm6, %v378_v62 }
 0x177   : > { %v383_v0 = vpop.permute.xlu1 %382  ;;  %v388_v1 = vpop.permute.xlu0 %387 }
 0x178   : > { %386 = vst.msk [vmem:[#allocation2] sm:$0xff] %vm385_vm7, %v383_v0 }
 0x179   : > { %391 = vst.msk [vmem:[#allocation2] sm:$0xff] %vm390_vm8, %v388_v1 }
 0x17b   : > { %v393_v2 = vpop.permute.xlu1 %392  ;;  %v398_v3 = vpop.permute.xlu0 %397 }
 0x17c   : > { %396 = vst.msk [vmem:[#allocation2] sm:$0xff] %vm395_vm9, %v393_v2 }
 0x17d   : > { %401 = vst.msk [vmem:[#allocation2] sm:$0xff] %vm400_vm10, %v398_v3 }
 0x17f   : > { %v403_v4 = vpop.permute.xlu1 %402 }
 0x180   : > { %406 = vst.msk [vmem:[#allocation2] sm:$0xff] %vm405_vm11, %v403_v4 }
 0x183   : > { %v428_v5 = vpop.permute.xlu1 %427 }
 0x184   : > { %v430_v6 = vmax.f32 %v425_v61, %v428_v5  ;;  %v528_v5 = vstv %s527_s7 }
 0x186   : > { %431 = vst.msk [vmem:[#allocation2 + $0x10] sm:$0xff] %vm369_vm4, %v430_v6  ;;  %433 = vrot.lane.b32.xlu1 %v430_v6, %s1039_s25  ;;  %s524_s25 = sld [smem:[#allocation10]] }
 0x187   : > { %v407_v7 = vld [vmem:[#allocation2] sm:$0xff] }
 0x188   : > { %v462_v8 = vmax.f32 %v407_v7, 0.0 }
 0x18a   : > { %v464_v9 = vsel %vm463_vm12, %v462_v8, 0.0  ;;  %437 = vrot.lane.b32.xlu1 %v430_v6, %s1040_s12 }
 0x18b   : > { %465 = vadd.xlane.f32.xlu0 %v464_v9 }
 0x18c   : > { %v525_v2 = vstv %s524_s25 }
 0x18e   : > { %441 = vrot.lane.b32.xlu1 %v430_v6, %s1041_s16  ;;  %s754_s16 = sshll.u32 %s1237_s17, 3 }
 0x192   : > { %445 = vrot.lane.b32.xlu1 %v430_v6, %s1042_s30  ;;  %s765_s30 = sshll.u32 %s1101_s3, 7  ;;  %s1046_s3 = smov [#allocation12]  }
 0x193   : > { %s961_s25 = sshll.u32 %s1046_s3, 4  ;;  %s962_s25 = int_to_ptr.vmem [resolvable:$false] %s961_s25 }
 0x194   : > { %s963_s7 = scalar_lea.vmem %s962_s25, 256 }
 0x196   : > { %449 = vrot.lane.b32.xlu1 %v430_v6, %s1043_s11  ;;  %s282_s11 = scalar_lea.vmem [#allocation12], %s754_s16 }
 0x19a   : > { %453 = vrot.lane.b32.xlu1 %v430_v6, %s1044_s13  ;;  %s639_s13 = sshll.u32 %s282_s11, 4  ;;  %s1308_s13 = int_to_ptr.vmem [resolvable:$true] %s639_s13 }
 0x19b   : > { %p964_p2 = scmp.lt.s32.totalorder %s1308_s13, %s962_s25 }
 0x19e   : > { %457 = vrot.lane.b32.xlu1 %v430_v6, %s1045_s14  ;;  %v531_v6 = vstv %s763_s6 }
 0x1f8   : > { %v434_v10 = vpop.permute.xlu1 %433 }
 0x1f9   : > { %436 = vst.msk [vmem:[#allocation2 + $0x10] sm:$0xff] %vm375_vm5, %v434_v10 }
 0x1fc   : > { %v438_v11 = vpop.permute.xlu1 %437 }
 0x1fd   : > { %440 = vst.msk [vmem:[#allocation2 + $0x10] sm:$0xff] %vm380_vm6, %v438_v11 }
 0x200   : > { %v442_v12 = vpop.permute.xlu1 %441 }
 0x201   : > { %444 = vst.msk [vmem:[#allocation2 + $0x10] sm:$0xff] %vm385_vm7, %v442_v12 }
 0x204   : > { %v446_v13 = vpop.permute.xlu1 %445 }
 0x205   : > { %448 = vst.msk [vmem:[#allocation2 + $0x10] sm:$0xff] %vm390_vm8, %v446_v13 }
 0x208   : > { %v450_v14 = vpop.permute.xlu1 %449 }
 0x209   : > { %452 = vst.msk [vmem:[#allocation2 + $0x10] sm:$0xff] %vm395_vm9, %v450_v14 }
 0x20c   : > { %v454_v15 = vpop.permute.xlu1 %453 }
 0x20d   : > { %456 = vst.msk [vmem:[#allocation2 + $0x10] sm:$0xff] %vm400_vm10, %v454_v15 }
 0x210   : > { %v458_v16 = vpop.permute.xlu1 %457 }
 0x211   : > { %460 = vst.msk [vmem:[#allocation2 + $0x10] sm:$0xff] %vm405_vm11, %v458_v16 }
 0x218   : > { %v466_v17 = vpop.xlane.xlu0 %465  ;;  %v461_v18 = vld [vmem:[#allocation2 + $0x10] sm:$0xff] }
 0x219   : > { %v467_v19 = vrot.slane %v466_v17, 4  ;;  %v494_v20 = vmax.f32 %v461_v18, 0.0 }
 0x21b   : > { %v468_v21 = vadd.f32 %v467_v19, %v466_v17  ;;  %v495_v22 = vsel %vm463_vm12, %v494_v20, 0.0 }
 0x21c   : > { %496 = vadd.xlane.f32.xlu1 %v495_v22 }
 0x21d   : > { %v469_v23 = vrot.slane %v468_v21, 2 }
 0x21f   : > { %v470_v24 = vadd.f32 %v469_v23, %v468_v21 }
 0x221   : > { %v471_v25 = vrot.slane %v470_v24, 1 }
 0x223   : > { %v472_v26 = vadd.f32 %v471_v25, %v470_v24 }
 0x225   : > { %769 = vpush %v472_v26 }
 0x256   : > { %s770_s15 = spop %769 }
 0x257   : > { %v474_v27 = vstv %s770_s15 }
 0x258   : > { %v476_v28 = vmul.f32 0.015625, %v474_v27 }
 0x25a   : > { %v477_v29 = vsub.f32 %v462_v8, %v476_v28 }
 0x25c   : > { %v478_v30 = vmul.f32 %v477_v29, %v477_v29 }
 0x25e   : > { %v479_v31 = vsel %vm463_vm12, %v478_v30, 0.0 }
 0x25f   : > { %480 = vadd.xlane.f32.xlu0 %v479_v31 }
 0x2a9   : > { %v497_v32 = vpop.xlane.xlu1 %496 }
 0x2aa   : > { %v498_v33 = vrot.slane %v497_v32, 4 }
 0x2ac   : > { %v499_v34 = vadd.f32 %v498_v33, %v497_v32 }
 0x2ae   : > { %v500_v35 = vrot.slane %v499_v34, 2 }
 0x2b0   : > { %v501_v39 = vadd.f32 %v500_v35, %v499_v34 }
 0x2b2   : > { %v502_v42 = vrot.slane %v501_v39, 1 }
 0x2b4   : > { %v503_v45 = vadd.f32 %v502_v42, %v501_v39 }
 0x2ec   : > { %v481_v36 = vpop.xlane.xlu0 %480 }
 0x2ed   : > { %v482_v37 = vrot.slane %v481_v36, 4 }
 0x2ef   : > { %v483_v38 = vadd.f32 %v482_v37, %v481_v36 }
 0x2f1   : > { %v484_v40 = vrot.slane %v483_v38, 2 }
 0x2f3   : > { %v485_v41 = vadd.f32 %v484_v40, %v483_v38 }
 0x2f5   : > { %v486_v43 = vrot.slane %v485_v41, 1 }
 0x2f7   : > { %v487_v44 = vadd.f32 %v486_v43, %v485_v41 }
 0x2f9   : > { %771 = vpush %v487_v44 }
 0x2fa   : > { %773 = vpush %v503_v45 }
 0x32a   : > { %s772_s18 = spop %771 }
 0x32b   : > { %s774_s24 = spop %773  ;;  %v489_v58 = vstv %s772_s18  ;;  %s1306_s18 = scalar_lea.hbm %s1356_s5, %s765_s30 }
 0x32c   : > { %v505_v46 = vstv %s774_s24  ;;  %v490_v59 = vmul.f32 0.015625, %v489_v58  ;;  %s626_s24 = scalar_lea.sflag [#allocation6], %s1237_s17 }
 0x32d   : > { %v506_v47 = vmul.f32 0.015625, %v505_v46 }
 0x32e   : > { %v491_v60 = vadd.f32 1e-05, %v490_v59 }
 0x32f   : > { %v507_v48 = vsub.f32 %v494_v20, %v506_v47 }
 0x330   : > { %872 = vrsqrt.f32 %v491_v60 }
 0x331   : > { %v508_v49 = vmul.f32 %v507_v48, %v507_v48 }
 0x333   : > { %v509_v50 = vsel %vm463_vm12, %v508_v49, 0.0 }
 0x334   : > { %510 = vadd.xlane.f32.xlu0 %v509_v50 }
 0x33a   : > { %v873_v0 = vpop.eup %872 }
 0x33b   : > { %v493_v1 = vmul.f32 %v873_v0, %v477_v29 }
 0x33d   : > { %v526_v3 = vmul.f32 %v525_v2, %v493_v1 }
 0x33f   : > { %v529_v8 = vadd.f32 %v528_v5, %v526_v3 }
 0x3c1   : > { %v511_v51 = vpop.xlane.xlu0 %510 }
 0x3c2   : > { %v512_v52 = vrot.slane %v511_v51, 4 }
 0x3c4   : > { %v513_v53 = vadd.f32 %v512_v52, %v511_v51 }
 0x3c6   : > { %v514_v54 = vrot.slane %v513_v53, 2 }
 0x3c8   : > { %v515_v55 = vadd.f32 %v514_v54, %v513_v53 }
 0x3ca   : > { %v516_v56 = vrot.slane %v515_v55, 1 }
 0x3cc   : > { %v517_v57 = vadd.f32 %v516_v56, %v515_v55 }
 0x3ce   : > { %775 = vpush %v517_v57 }
 0x3ff   : > { %s776_s27 = spop %775 }
 0x400   : > { %v519_v61 = vstv %s776_s27  ;;  %s957_s27 = scalar_lea.vmem %s1308_s13, 128 }
 0x401   : > { %v520_v62 = vmul.f32 0.015625, %v519_v61  ;;  %p958_p12 = scmp.ne.s32.totalorder %s1308_s13, %s957_s27  ;;  %p965_p4 = scmp.lt.s32.totalorder %s963_s7, %s957_s27 }
 0x403   : > { %v521_v63 = vadd.f32 1e-05, %v520_v62  ;;  %p959_p0 = pnand %p958_p12, %p1181_p9  ;;  %p966_p6 = por %p965_p4, %p964_p2 }
 0x405   : > { %874 = vrsqrt.f32 %v521_v63  ;;  %p960_p3 = pneg %p959_p0 }
 0x407   : > { %p967_p8 = pnand %p966_p6, %p960_p3 }
 0x40f   : > { %v875_v4 = vpop.eup %874 }
 0x410   : > { %v523_v7 = vmul.f32 %v875_v4, %v507_v48 }
 0x412   : > { %v532_v9 = vmul.f32 %v531_v6, %v523_v7 }
 0x414   : > { %v533_v10 = vadd.f32 %v532_v9, %v529_v8 }
 0x416   : > { %v534_v11 = vmax.f32 %v533_v10, 0.0 }
 0x418   : > { %v535_v12 = vsel %vm463_vm12, %v534_v11, 0.0 }
 0x419   : > { %536 = vadd.xlane.f32.xlu0 %v535_v12 }
 0x4a6   : > { %v537_v13 = vpop.xlane.xlu0 %536 }
 0x4a7   : > { %v538_v14 = vrot.slane %v537_v13, 4 }
 0x4a9   : > { %v539_v15 = vadd.f32 %v538_v14, %v537_v13 }
 0x4ab   : > { %v540_v16 = vrot.slane %v539_v15, 2 }
 0x4ad   : > { %v541_v17 = vadd.f32 %v540_v16, %v539_v15 }
 0x4af   : > { %v542_v18 = vrot.slane %v541_v17, 1 }
 0x4b1   : > { %v543_v19 = vadd.f32 %v542_v18, %v541_v17 }
 0x4b3   : > { %777 = vpush %v543_v19 }
 0x4e4   : > { %s778_s8 = spop %777 }
 0x4e5   : > { %v545_v20 = vstv %s778_s8 }
 0x4e6   : > { %v546_v21 = vmul.f32 0.015625, %v545_v20 }
 0x4e8   : > { %v547_v22 = vsub.f32 %v534_v11, %v546_v21 }
 0x4ea   : > { %v548_v23 = vmul.f32 %v547_v22, %v547_v22 }
 0x4ec   : > { %v549_v24 = vsel %vm463_vm12, %v548_v23, 0.0 }
 0x4ed   : > { %550 = vadd.xlane.f32.xlu0 %v549_v24 }
 0x57a   : > { %v551_v25 = vpop.xlane.xlu0 %550 }
 0x57b   : > { %v552_v26 = vrot.slane %v551_v25, 4 }
 0x57d   : > { %v553_v27 = vadd.f32 %v552_v26, %v551_v25 }
 0x57f   : > { %v554_v28 = vrot.slane %v553_v27, 2 }
 0x581   : > { %v555_v29 = vadd.f32 %v554_v28, %v553_v27 }
 0x583   : > { %v556_v30 = vrot.slane %v555_v29, 1 }
 0x585   : > { %v557_v31 = vadd.f32 %v556_v30, %v555_v29 }
 0x587   : > { %779 = vpush %v557_v31 }
 0x5b8   : > { %s780_s9 = spop %779 }
 0x5b9   : > { %v559_v32 = vstv %s780_s9 }
 0x5ba   : > { %v560_v33 = vmul.f32 0.015625, %v559_v32 }
 0x5bc   : > { %v561_v34 = vadd.f32 1e-05, %v560_v33 }
 0x5be   : > { %876 = vrsqrt.f32 %v561_v34 }
 0x5c8   : > { %v877_v35 = vpop.eup %876 }
 0x5c9   : > { %v563_v36 = vmul.f32 %v877_v35, %v547_v22 }
 0x5cb   : > { %564 = vxpose.xlu0.b32.start.end [1/1] (short) (narrow) %v563_v36, 8 }
 0x64b   : > { %v580_v37 = vpop.trf.xlu0 }
 0x64c   : > { %v596_v38 = vadd.f32 %v580_v37, %v563_v36 }
 0x64e   : > { %v597_v39 = vsel %vm463_vm12, %v596_v38, -inf }
 0x64f   : > { %598 = vmax.xlane.f32.xlu1 %v597_v39 }
 0x6dc   : > { %v599_v40 = vpop.xlane.xlu1 %598 }
 0x6dd   : > { %v600_v41 = vrot.slane %v599_v40, 4 }
 0x6df   : > { %v601_v42 = vmax.f32 %v599_v40, %v600_v41 }
 0x6e1   : > { %v602_v43 = vrot.slane %v601_v42, 2 }
 0x6e3   : > { %v603_v44 = vmax.f32 %v601_v42, %v602_v43 }
 0x6e5   : > { %v604_v45 = vrot.slane %v603_v44, 1 }
 0x6e7   : > { %v605_v46 = vmax.f32 %v603_v44, %v604_v45 }
 0x6e9   : > { %781 = vpush %v605_v46 }
 0x71a   : > { %s782_s10 = spop %781 }
 0x71b   : > { %v607_v47 = vstv %s782_s10 }
 0x71c   : > { %v608_v48 = vsub.f32 %v596_v38, %v607_v47 }
 0x71e   : > { %v609_v49 = vmul.f32 1.442695, %v608_v48 }
 0x720   : > { %878 = vpow2.f32 %v609_v49 }
 0x72a   : > { %v879_v50 = vpop.eup %878 }
 0x72b   : > { %v611_v51 = vsel %vm463_vm12, %v879_v50, 0.0 }
 0x72c   : > { %612 = vadd.xlane.f32.xlu1 %v611_v51 }
 0x7b9   : > { %v613_v52 = vpop.xlane.xlu1 %612 }
 0x7ba   : > { %v614_v53 = vrot.slane %v613_v52, 4 }
 0x7bc   : > { %v615_v54 = vadd.f32 %v614_v53, %v613_v52 }
 0x7be   : > { %v616_v55 = vrot.slane %v615_v54, 2 }
 0x7c0   : > { %v617_v56 = vadd.f32 %v616_v55, %v615_v54 }
 0x7c2   : > { %v618_v57 = vrot.slane %v617_v56, 1 }
 0x7c4   : > { %v619_v58 = vadd.f32 %v618_v57, %v617_v56 }
 0x7c6   : > { %783 = vpush %v619_v58 }
 0x7f7   : > { %s784_s12 = spop %783 }
 0x7f8   : > { %v621_v59 = vstv %s784_s12 }
 0x7f9   : > { %880 = vrcp.f32 %v621_v59 }
 0x803   : > { %v881_v60 = vpop.eup %880 }
 0x804   : > { %v623_v61 = vmul.f32 %v881_v60, %v879_v50 }
 0x806   : > { %624 = vst.msk [vmem:[%s282_s11] sm:$0xff] %vm463_vm12, %v623_v61 }
 0x807   : > { %970 = shalt.err (!%p967_p8)
}
 0x808   : > { %s971_s17 = scalar_lea.hbm %s1306_s18, 128  ;;  %s975_s9 = scalar_lea.hbm %s1356_s5, 256 }
 0x809   : > { %p972_p1 = scmp.ne.s32.totalorder %s1306_s18, %s971_s17  ;;  %p976_p7 = scmp.lt.u32.totalorder %s1306_s18, %s1356_s5 }
 0x80a   : > { %p977_p10 = scmp.lt.u32.totalorder %s975_s9, %s971_s17  ;;  %p979_p12 = scmp.lt.u32.totalorder %s971_s17, %s1306_s18 }
 0x80b   : > { %p973_p5 = pnand %p972_p1, %p1181_p9 }
 0x80c   : > { %p978_p11 = por %p977_p10, %p976_p7 }
 0x80d   : > { %p974_p13 = pneg %p973_p5 }
 0x80e   : > { %p980_p0 = por %p979_p12, %p978_p11 }
 0x810   : > { %p981_p3 = pnand %p980_p0, %p974_p13 }
 0x812   : > { %984 = shalt.err (!%p981_p3)
}
 0x813   : > { %799 = dma.vmem_to_hbm [thread:$0]  (%p1181_p9), %s1308_s13, 128, %s1306_s18, %s626_s24  }
 0x814 PF: > { %s651_s16 = sand.u32 1, %s1019_s20   ;;  %p1373_p2 = scmp.ne.s32.totalorder %s1361_s26, 0 }
 0x815   : > { %p1374_p4 = scmp.ge.s32.totalorder %s1031_s23, 2  ;;  %s652_s30 = scalar_lea.sflag [#allocation6], %s651_s16 }
 0x817   : > { %p816_p6 = pnand %p1374_p4, %p1373_p2 }
 0x819   : > { %1014 = dma.done.wait (!%p816_p6), %s652_s30, 128  }
 0x81a   : > { %1016 = vsyncadd (!%p816_p6), %s652_s30, 4294967168  ;;  %p21_p8 = scmp.ge.s32.totalorder %s1167_s19, 4   ;;  %s1375_s20 = smov %s1023_s21 }
 0x81b   : > { %s1376_s21 = smov %s1027_s22  ;;  %s1377_s22 = smov %s1177_s28 }
 0x81c   : > { %s1378_s23 = smov %s1167_s19  ;;  %23 = sbr.rel (!%p21_p8) target bundleno = 9 (0x9), region = 99 }
 0x823   :  { %657 = vsyncpa [#allocation5], 1 }
 0x824   :  { %659 = vsyncpa [#allocation5 + $0x1], 1 }
 0x825   :  { %660 = vsyncpa [#allocation6], 1 }
 0x826   :  { %662 = vsyncpa [#allocation6 + $0x1], 1 }
 0x827   :  { %663 = vsyncpa [#allocation7], 1 }
 0x828   :  { %665 = vsyncpa [#allocation7 + $0x1], 1 }
 0x829   :  { %666 = vsyncpa [#allocation9], 1 }

</bundles_post_ra>
